<compile_context>
chip_gen: v5e
topology: v5e:2x2
jax: 0.10.0
libtpu: 0.0.40
codegen_flags: <defaults>
</compile_context>

<pallas_src>
import functools

import jax
import jax.numpy as jnp
from jax.experimental import pallas as pl
from jax.experimental.pallas import tpu as pltpu


def _round_up(x, m):
    return (x + m - 1) // m * m


def _pick_tile(padded_b, preferred):
    for t in (preferred, 512, 256, 128):
        if t % 128 == 0 and t <= padded_b and padded_b % t == 0:
            return t
    return 128  # unreachable: padded_b is always a multiple of 128


def _supcon_kernel(lab_row_ref, lab_col_ref, frow_ref, fcol_ref, out_ref,
                   m_sc, l_sc, psum_sc, pcnt_sc, *,
                   inv_temperature, loss_scale, batch_size):
    j = pl.program_id(1)
    n_col = pl.num_programs(1)
    tm = frow_ref.shape[0]
    tn = fcol_ref.shape[0]

    @pl.when(j == 0)
    def _():
        m_sc[...] = jnp.full_like(m_sc, -jnp.inf)
        l_sc[...] = jnp.zeros_like(l_sc)
        psum_sc[...] = jnp.zeros_like(psum_sc)
        pcnt_sc[...] = jnp.zeros_like(pcnt_sc)

    row_base = pl.program_id(0) * tm
    col_base = j * tn
    row_ids = row_base + jax.lax.broadcasted_iota(jnp.int32, (tm, tn), 0)
    col_ids = col_base + jax.lax.broadcasted_iota(jnp.int32, (tm, tn), 1)

    col_valid = col_ids < batch_size                      # exclude padded columns
    logits_mask = jnp.logical_and(col_valid, row_ids != col_ids)  # drop diagonal

    # Positive mask from exact int32 compares (labels column vs labels row).
    label_eq = lab_row_ref[...] == lab_col_ref[...]       # (tm, 1) == (1, tn)
    pos_mask = jnp.logical_and(label_eq, logits_mask).astype(jnp.float32)

    # s_ij = (f_i . f_j) / T ; fold 1/T into the row tile, contract over D on
    # both operands ('nt' matmul, no transpose materialized).
    f_r = frow_ref[...] * inv_temperature                 # (tm, D)
    s = jax.lax.dot_general(
        f_r, fcol_ref[...],
        dimension_numbers=(((1,), (1,)), ((), ())),
        preferred_element_type=jnp.float32)               # (tm, tn)

    # Online softmax denominator (diagonal and padded columns excluded; the
    # running max includes the diagonal, matching the reference's logits_max).
    s_for_max = jnp.where(col_valid, s, -jnp.inf)
    m_new = jnp.maximum(m_sc[...], jnp.max(s_for_max, axis=1, keepdims=True))
    alpha = jnp.exp(m_sc[...] - m_new)
    p = jnp.where(logits_mask, jnp.exp(s - m_new), 0.0)
    l_sc[...] = alpha * l_sc[...] + jnp.sum(p, axis=1, keepdims=True)
    m_sc[...] = m_new

    # Accumulate sum(mask * s) and positive counts.
    psum_sc[...] += jnp.sum(pos_mask * s, axis=1, keepdims=True)
    pcnt_sc[...] += jnp.sum(pos_mask, axis=1, keepdims=True)

    @pl.when(j == n_col - 1)
    def _():
        row_valid = (row_base
                     + jax.lax.broadcasted_iota(jnp.int32, (tm, 1), 0)
                     ) < batch_size
        # log_denom = rowmax + log(sum exp(s - rowmax) over non-self columns)
        log_denom = m_sc[...] + jnp.log(l_sc[...])
        # sum(mask * log_prob) / cnt == sum(mask*s)/cnt - log_denom
        mean_log_prob_pos = psum_sc[...] / pcnt_sc[...] - log_denom
        loss_row = -loss_scale * mean_log_prob_pos        # (tm, 1)
        loss_row = jnp.where(row_valid, loss_row, 0.0)    # zero padded rows
        out_ref[...] = jnp.broadcast_to(loss_row, out_ref.shape)  # lane-dense


def supcon_loss_pair(features, labels, temperature=0.07, base_temperature=0.07,
                     row_tile=256, col_tile=512):
    """features: [B, D] float, labels: [B] int -> scalar loss.

    row_tile / col_tile must be multiples of 128 (they are clamped to the
    padded batch size).
    """
    B, D = features.shape
    f = features.astype(jnp.float32)
    lab = labels.reshape(-1).astype(jnp.int32)

    Bp = _round_up(B, 128)
    tm = _pick_tile(Bp, row_tile)
    tn = _pick_tile(Bp, col_tile)

    pad = Bp - B
    if pad:
        f = jnp.pad(f, ((0, pad), (0, 0)))
        lab = jnp.pad(lab, (0, pad), constant_values=-1)
    lab_row = lab.reshape(Bp, 1)
    lab_col = lab.reshape(1, Bp)

    kernel = functools.partial(
        _supcon_kernel,
        inv_temperature=float(1.0 / temperature),
        loss_scale=float(temperature / base_temperature),
        batch_size=B,
    )

    out = pl.pallas_call(
        kernel,
        out_shape=jax.ShapeDtypeStruct((Bp, 128), jnp.float32),
        grid_spec=pltpu.PrefetchScalarGridSpec(
            num_scalar_prefetch=0,
            grid=(Bp // tm, Bp // tn),          # reduction (column) axis last
            in_specs=[
                pl.BlockSpec((tm, 1), lambda i, j: (i, 0)),   # labels column
                pl.BlockSpec((1, tn), lambda i, j: (0, j)),   # labels row
                pl.BlockSpec((tm, D), lambda i, j: (i, 0)),   # anchor rows
                pl.BlockSpec((tn, D), lambda i, j: (j, 0)),   # contrast rows
            ],
            out_specs=pl.BlockSpec((tm, 128), lambda i, j: (i, 0)),
            scratch_shapes=[
                pltpu.VMEM((tm, 1), jnp.float32),   # running max m_i
                pltpu.VMEM((tm, 1), jnp.float32),   # running denom l_i
                pltpu.VMEM((tm, 1), jnp.float32),   # sum(mask * s)
                pltpu.VMEM((tm, 1), jnp.float32),   # positive count
            ],
        ),
        compiler_params=pltpu.CompilerParams(
            dimension_semantics=("parallel", "arbitrary")),
    )(lab_row, lab_col, f, f)

    per_row = out[:B, 0]
    return jnp.sum(per_row) / B


def _reference(features, labels, temperature=0.07, base_temperature=0.07):
    f = features.astype(jnp.float32)
    B = f.shape[0]
    lab = labels.reshape(B, 1)
    mask_label = (lab == lab.T).astype(jnp.float32)
    s = (f @ f.T) / temperature
    logits = s - jnp.max(s, axis=1, keepdims=True)
    logits_mask = 1.0 - jnp.eye(B, dtype=jnp.float32)
    mask = mask_label * logits_mask
    exp_logits = jnp.exp(logits) * logits_mask
    log_prob = logits - jnp.log(jnp.sum(exp_logits, axis=1, keepdims=True))
    mean_log_prob_pos = jnp.sum(mask * log_prob, axis=1) / jnp.sum(mask, axis=1)
    loss = -(temperature / base_temperature) * mean_log_prob_pos
    return jnp.mean(loss)


if __name__ == "__main__":
    key = jax.random.PRNGKey(0)
    B, D = 200, 32
    feats = jax.random.normal(key, (B, D), dtype=jnp.float32)
    # L2-normalize (standard for SupCon inputs; does not change kernel semantics)
    feats = feats / jnp.linalg.norm(feats, axis=1, keepdims=True)
    # Deterministic labels; every class has >= 2 members so mask.sum(1) > 0.
    labels = jnp.arange(B, dtype=jnp.int32) % 8

    # Small tiles so the test exercises the multi-tile grid, the online-softmax
    # accumulation across column tiles, and the batch padding path (Bp = 256).
    loss = supcon_loss_pair(feats, labels, temperature=0.07,
                            row_tile=128, col_tile=128)
    loss = jax.block_until_ready(loss)

    ref = _reference(feats, labels, temperature=0.07)
    assert jnp.allclose(loss, ref, rtol=1e-4, atol=1e-4), (loss, ref)
    print("KERNEL_OK")
</pallas_src>

<mosaic_0001>
module attributes {stable_mosaic.version = 11 : i64} {
  func.func @_supcon_kernel(%arg0: i32, %arg1: i32, %arg2: memref<128x1xi32, #tpu.memory_space<vmem>>, %arg3: memref<1x128xi32, #tpu.memory_space<vmem>>, %arg4: memref<128x32xf32, #tpu.memory_space<vmem>>, %arg5: memref<128x32xf32, #tpu.memory_space<vmem>>, %arg6: memref<128x128xf32, #tpu.memory_space<vmem>>, %arg7: memref<128x1xf32, #tpu.memory_space<vmem>>, %arg8: memref<128x1xf32, #tpu.memory_space<vmem>>, %arg9: memref<128x1xf32, #tpu.memory_space<vmem>>, %arg10: memref<128x1xf32, #tpu.memory_space<vmem>>) attributes {dimension_semantics = [#tpu.dimension_semantics<parallel>, #tpu.dimension_semantics<arbitrary>], iteration_bounds = array<i64: 2, 2>, scalar_prefetch = 0 : i64, scratch_operands = 4 : i64, tpu.core_type = #tpu.core_type<tc>, window_params = [{transform_indices = @transform_0, window_bounds = array<i64: 128, 1>}, {transform_indices = @transform_1, window_bounds = array<i64: 1, 128>}, {transform_indices = @transform_2, window_bounds = array<i64: 128, 32>}, {transform_indices = @transform_3, window_bounds = array<i64: 128, 32>}, {transform_indices = @transform_4, window_bounds = array<i64: 128, 128>}]} {
    %c0_i32 = arith.constant 0 : i32
    %0 = arith.cmpi eq, %arg1, %c0_i32 : i32
    %1 = arith.extui %0 : i1 to i32
    %c0_i32_0 = arith.constant 0 : i32
    %2 = arith.cmpi ne, %1, %c0_i32_0 : i32
    scf.if %2 {
      %cst_35 = arith.constant 0xFF800000 : f32
      %63 = vector.broadcast %cst_35 : f32 to vector<128x1xf32>
      %c0_36 = arith.constant 0 : index
      %c0_37 = arith.constant 0 : index
      %64 = vector.load %arg7[%c0_36, %c0_37] : memref<128x1xf32, #tpu.memory_space<vmem>>, vector<128x1xf32>
      tpu.vector_store %arg7[%c0_36, %c0_37], %63 {strides = array<i32>} : memref<128x1xf32, #tpu.memory_space<vmem>>, vector<128x1xf32>,
      %cst_38 = arith.constant 0.000000e+00 : f32
      %65 = vector.broadcast %cst_38 : f32 to vector<128x1xf32>
      %c0_39 = arith.constant 0 : index
      %c0_40 = arith.constant 0 : index
      %66 = vector.load %arg8[%c0_39, %c0_40] : memref<128x1xf32, #tpu.memory_space<vmem>>, vector<128x1xf32>
      tpu.vector_store %arg8[%c0_39, %c0_40], %65 {strides = array<i32>} : memref<128x1xf32, #tpu.memory_space<vmem>>, vector<128x1xf32>,
      %cst_41 = arith.constant 0.000000e+00 : f32
      %67 = vector.broadcast %cst_41 : f32 to vector<128x1xf32>
      %c0_42 = arith.constant 0 : index
      %c0_43 = arith.constant 0 : index
      %68 = vector.load %arg9[%c0_42, %c0_43] : memref<128x1xf32, #tpu.memory_space<vmem>>, vector<128x1xf32>
      tpu.vector_store %arg9[%c0_42, %c0_43], %67 {strides = array<i32>} : memref<128x1xf32, #tpu.memory_space<vmem>>, vector<128x1xf32>,
      %cst_44 = arith.constant 0.000000e+00 : f32
      %69 = vector.broadcast %cst_44 : f32 to vector<128x1xf32>
      %c0_45 = arith.constant 0 : index
      %c0_46 = arith.constant 0 : index
      %70 = vector.load %arg10[%c0_45, %c0_46] : memref<128x1xf32, #tpu.memory_space<vmem>>, vector<128x1xf32>
      tpu.vector_store %arg10[%c0_45, %c0_46], %69 {strides = array<i32>} : memref<128x1xf32, #tpu.memory_space<vmem>>, vector<128x1xf32>,
    } else {
    }
    %c128_i32 = arith.constant 128 : i32
    %3 = arith.muli %arg0, %c128_i32 : i32
    %c128_i32_1 = arith.constant 128 : i32
    %4 = arith.muli %arg1, %c128_i32_1 : i32
    %5 = tpu.iota {dimensions = array<i32: 0>} : vector<128x128xi32>
    %6 = vector.broadcast %3 : i32 to vector<128x128xi32>
    %7 = arith.addi %6, %5 : vector<128x128xi32>
    %8 = tpu.iota {dimensions = array<i32: 1>} : vector<128x128xi32>
    %9 = vector.broadcast %4 : i32 to vector<128x128xi32>
    %10 = arith.addi %9, %8 : vector<128x128xi32>
    %c200_i32 = arith.constant 200 : i32
    %11 = vector.broadcast %c200_i32 : i32 to vector<128x128xi32>
    %12 = arith.cmpi slt, %10, %11 : vector<128x128xi32>
    %13 = arith.cmpi ne, %7, %10 : vector<128x128xi32>
    %14 = arith.andi %12, %13 : vector<128x128xi1>
    %c0 = arith.constant 0 : index
    %c0_2 = arith.constant 0 : index
    %15 = vector.load %arg2[%c0, %c0_2] : memref<128x1xi32, #tpu.memory_space<vmem>>, vector<128x1xi32>
    %c0_3 = arith.constant 0 : index
    %c0_4 = arith.constant 0 : index
    %16 = vector.load %arg3[%c0_3, %c0_4] : memref<1x128xi32, #tpu.memory_space<vmem>>, vector<1x128xi32>
    %17 = vector.broadcast %15 : vector<128x1xi32> to vector<128x128xi32>
    %18 = vector.broadcast %16 : vector<1x128xi32> to vector<128x128xi32>
    %19 = arith.cmpi eq, %17, %18 : vector<128x128xi32>
    %20 = arith.andi %19, %14 : vector<128x128xi1>
    %21 = arith.extui %20 : vector<128x128xi1> to vector<128x128xi32>
    %22 = arith.sitofp %21 : vector<128x128xi32> to vector<128x128xf32>
    %c0_5 = arith.constant 0 : index
    %c0_6 = arith.constant 0 : index
    %23 = vector.load %arg4[%c0_5, %c0_6] : memref<128x32xf32, #tpu.memory_space<vmem>>, vector<128x32xf32>
    %cst = arith.constant 14.2857141 : f32
    %24 = vector.broadcast %cst : f32 to vector<128x32xf32>
    %25 = arith.mulf %23, %24 : vector<128x32xf32>
    %c0_7 = arith.constant 0 : index
    %c0_8 = arith.constant 0 : index
    %26 = vector.load %arg5[%c0_7, %c0_8] : memref<128x32xf32, #tpu.memory_space<vmem>>, vector<128x32xf32>
    %cst_9 = arith.constant dense<0.000000e+00> : vector<128x128xf32>
    %27 = tpu.matmul %25, %26, %cst_9 {dimension_numbers = #tpu.dot_dimension_numbers<[1], [1], [0], [0], [0, 0, 1, 0], [], []>} : vector<128x32xf32>, vector<128x32xf32>, vector<128x128xf32> -> vector<128x128xf32>
    %cst_10 = arith.constant 0xFF800000 : f32
    %28 = vector.broadcast %cst_10 : f32 to vector<128x128xf32>
    %29 = arith.select %12, %27, %28 : vector<128x128xi1>, vector<128x128xf32>
    %c0_11 = arith.constant 0 : index
    %c0_12 = arith.constant 0 : index
    %30 = vector.load %arg7[%c0_11, %c0_12] : memref<128x1xf32, #tpu.memory_space<vmem>>, vector<128x1xf32>
    %cst_13 = arith.constant dense<0xFF800000> : vector<128xf32>
    %31 = vector.multi_reduction <maximumf>, %29, %cst_13 [1] : vector<128x128xf32> to vector<128xf32>
    %32 = vector.shape_cast %31 : vector<128xf32> to vector<128x1xf32>
    %33 = arith.maximumf %30, %32 : vector<128x1xf32>
    %c0_14 = arith.constant 0 : index
    %c0_15 = arith.constant 0 : index
    %34 = vector.load %arg7[%c0_14, %c0_15] : memref<128x1xf32, #tpu.memory_space<vmem>>, vector<128x1xf32>
    %35 = arith.subf %34, %33 : vector<128x1xf32>
    %36 = math.exp %35 : vector<128x1xf32>
    %37 = vector.broadcast %33 : vector<128x1xf32> to vector<128x128xf32>
    %38 = arith.subf %27, %37 : vector<128x128xf32>
    %39 = math.exp %38 : vector<128x128xf32>
    %cst_16 = arith.constant 0.000000e+00 : f32
    %40 = vector.broadcast %cst_16 : f32 to vector<128x128xf32>
    %41 = arith.select %14, %39, %40 : vector<128x128xi1>, vector<128x128xf32>
    %c0_17 = arith.constant 0 : index
    %c0_18 = arith.constant 0 : index
    %42 = vector.load %arg8[%c0_17, %c0_18] : memref<128x1xf32, #tpu.memory_space<vmem>>, vector<128x1xf32>
    %43 = arith.mulf %36, %42 : vector<128x1xf32>
    %cst_19 = arith.constant dense<0.000000e+00> : vector<128xf32>
    %44 = vector.multi_reduction <add>, %41, %cst_19 [1] : vector<128x128xf32> to vector<128xf32>
    %45 = vector.shape_cast %44 : vector<128xf32> to vector<128x1xf32>
    %46 = arith.addf %43, %45 : vector<128x1xf32>
    %c0_20 = arith.constant 0 : index
    %c0_21 = arith.constant 0 : index
    %47 = vector.load %arg8[%c0_20, %c0_21] : memref<128x1xf32, #tpu.memory_space<vmem>>, vector<128x1xf32>
    tpu.vector_store %arg8[%c0_20, %c0_21], %46 {strides = array<i32>} : memref<128x1xf32, #tpu.memory_space<vmem>>, vector<128x1xf32>,
    %c0_22 = arith.constant 0 : index
    %c0_23 = arith.constant 0 : index
    %48 = vector.load %arg7[%c0_22, %c0_23] : memref<128x1xf32, #tpu.memory_space<vmem>>, vector<128x1xf32>
    tpu.vector_store %arg7[%c0_22, %c0_23], %33 {strides = array<i32>} : memref<128x1xf32, #tpu.memory_space<vmem>>, vector<128x1xf32>,
    %c0_24 = arith.constant 0 : index
    %c0_25 = arith.constant 0 : index
    %49 = vector.load %arg9[%c0_24, %c0_25] : memref<128x1xf32, #tpu.memory_space<vmem>>, vector<128x1xf32>
    %50 = arith.mulf %22, %27 : vector<128x128xf32>
    %cst_26 = arith.constant dense<0.000000e+00> : vector<128xf32>
    %51 = vector.multi_reduction <add>, %50, %cst_26 [1] : vector<128x128xf32> to vector<128xf32>
    %52 = vector.shape_cast %51 : vector<128xf32> to vector<128x1xf32>
    %53 = arith.addf %49, %52 : vector<128x1xf32>
    %c0_27 = arith.constant 0 : index
    %c0_28 = arith.constant 0 : index
    %54 = vector.load %arg9[%c0_27, %c0_28] : memref<128x1xf32, #tpu.memory_space<vmem>>, vector<128x1xf32>
    tpu.vector_store %arg9[%c0_27, %c0_28], %53 {strides = array<i32>} : memref<128x1xf32, #tpu.memory_space<vmem>>, vector<128x1xf32>,
    %c0_29 = arith.constant 0 : index
    %c0_30 = arith.constant 0 : index
    %55 = vector.load %arg10[%c0_29, %c0_30] : memref<128x1xf32, #tpu.memory_space<vmem>>, vector<128x1xf32>
    %cst_31 = arith.constant dense<0.000000e+00> : vector<128xf32>
    %56 = vector.multi_reduction <add>, %22, %cst_31 [1] : vector<128x128xf32> to vector<128xf32>
    %57 = vector.shape_cast %56 : vector<128xf32> to vector<128x1xf32>
    %58 = arith.addf %55, %57 : vector<128x1xf32>
    %c0_32 = arith.constant 0 : index
    %c0_33 = arith.constant 0 : index
    %59 = vector.load %arg10[%c0_32, %c0_33] : memref<128x1xf32, #tpu.memory_space<vmem>>, vector<128x1xf32>
    tpu.vector_store %arg10[%c0_32, %c0_33], %58 {strides = array<i32>} : memref<128x1xf32, #tpu.memory_space<vmem>>, vector<128x1xf32>,
    %c1_i32 = arith.constant 1 : i32
    %60 = arith.cmpi eq, %arg1, %c1_i32 : i32
    %61 = arith.extui %60 : i1 to i32
    %c0_i32_34 = arith.constant 0 : i32
    %62 = arith.cmpi ne, %61, %c0_i32_34 : i32
    scf.if %62 {
      %63 = tpu.iota {dimensions = array<i32: 0>} : vector<128x1xi32>
      %64 = vector.broadcast %3 : i32 to vector<128x1xi32>
      %65 = arith.addi %64, %63 : vector<128x1xi32>
      %c200_i32_35 = arith.constant 200 : i32
      %66 = vector.broadcast %c200_i32_35 : i32 to vector<128x1xi32>
      %67 = arith.cmpi slt, %65, %66 : vector<128x1xi32>
      %c0_36 = arith.constant 0 : index
      %c0_37 = arith.constant 0 : index
      %68 = vector.load %arg7[%c0_36, %c0_37] : memref<128x1xf32, #tpu.memory_space<vmem>>, vector<128x1xf32>
      %c0_38 = arith.constant 0 : index
      %c0_39 = arith.constant 0 : index
      %69 = vector.load %arg8[%c0_38, %c0_39] : memref<128x1xf32, #tpu.memory_space<vmem>>, vector<128x1xf32>
      %70 = math.log %69 : vector<128x1xf32>
      %71 = arith.addf %68, %70 : vector<128x1xf32>
      %c0_40 = arith.constant 0 : index
      %c0_41 = arith.constant 0 : index
      %72 = vector.load %arg9[%c0_40, %c0_41] : memref<128x1xf32, #tpu.memory_space<vmem>>, vector<128x1xf32>
      %c0_42 = arith.constant 0 : index
      %c0_43 = arith.constant 0 : index
      %73 = vector.load %arg10[%c0_42, %c0_43] : memref<128x1xf32, #tpu.memory_space<vmem>>, vector<128x1xf32>
      %74 = arith.divf %72, %73 : vector<128x1xf32>
      %75 = arith.subf %74, %71 : vector<128x1xf32>
      %cst_44 = arith.constant -1.000000e+00 : f32
      %76 = vector.broadcast %cst_44 : f32 to vector<128x1xf32>
      %77 = arith.mulf %76, %75 : vector<128x1xf32>
      %cst_45 = arith.constant 0.000000e+00 : f32
      %78 = vector.broadcast %cst_45 : f32 to vector<128x1xf32>
      %79 = arith.select %67, %77, %78 : vector<128x1xi1>, vector<128x1xf32>
      %80 = vector.shape_cast %79 : vector<128x1xf32> to vector<128x1xf32>
      %81 = vector.broadcast %80 : vector<128x1xf32> to vector<128x128xf32>
      %c0_46 = arith.constant 0 : index
      %c0_47 = arith.constant 0 : index
      %82 = vector.load %arg6[%c0_46, %c0_47] : memref<128x128xf32, #tpu.memory_space<vmem>>, vector<128x128xf32>
      tpu.vector_store %arg6[%c0_46, %c0_47], %81 {strides = array<i32>} : memref<128x128xf32, #tpu.memory_space<vmem>>, vector<128x128xf32>,
    } else {
    }
    return
  }
  func.func @transform_0(%arg0: i32, %arg1: i32) -> (i32, i32) {
    %c0_i32 = arith.constant 0 : i32
    %c0_i32_0 = arith.constant 0 : i32
    return %arg0, %c0_i32 : i32, i32
  }
  func.func @transform_1(%arg0: i32, %arg1: i32) -> (i32, i32) {
    %c0_i32 = arith.constant 0 : i32
    %c0_i32_0 = arith.constant 0 : i32
    return %c0_i32, %arg1 : i32, i32
  }
  func.func @transform_2(%arg0: i32, %arg1: i32) -> (i32, i32) {
    %c0_i32 = arith.constant 0 : i32
    %c0_i32_0 = arith.constant 0 : i32
    return %arg0, %c0_i32 : i32, i32
  }
  func.func @transform_3(%arg0: i32, %arg1: i32) -> (i32, i32) {
    %c0_i32 = arith.constant 0 : i32
    %c0_i32_0 = arith.constant 0 : i32
    return %arg1, %c0_i32 : i32, i32
  }
  func.func @transform_4(%arg0: i32, %arg1: i32) -> (i32, i32) {
    %c0_i32 = arith.constant 0 : i32
    %c0_i32_0 = arith.constant 0 : i32
    return %arg0, %c0_i32 : i32, i32
  }
}

</mosaic_0001>

<bundles_post_ra>
// kernel: tpu_custom_call.1
= control target key start
LH: loop header
LB: loop body
LE: loop exit
PB: predicated region body
PF: predicated region fallthrough
CT: control target
= control target key end

     0   :  { %9 = vsyncpa [#allocation7], 0  ;;  %s3929_s0 = inlined_call_operand.vmem [shape: s32[256,1], index: 0, kind: input, shape index: {}]   ;;  %s3930_s1 = inlined_call_operand.vmem [shape: s32[1,256], index: 1, kind: input, shape index: {}]   ;;  %s3931_s2 = inlined_call_operand.vmem [shape: f32[256,32], index: 2, kind: input, shape index: {}]   ;;  %s3932_s3 = inlined_call_operand.vmem [shape: f32[256,32], index: 3, kind: input, shape index: {}]   ;;  %s3933_s4 = inlined_call_operand.hbm [shape: f32[256,128], index: 4, kind: output, shape index: {}]  }
   0x1   :  { %11 = vsyncpa [#allocation7 + $0x1], 0  ;;  %s2409_s15 = smov 0   ;;  %s2411_s16 = smov 0  }
   0x2   :  { %s2413_s17 = smov 0   ;;  %s2415_s18 = smov 0  }
   0x3   :  { %s2417_s19 = smov 0   ;;  %s2419_s20 = smov 0  }
   0x4   :  { %s2421_s21 = smov 0   ;;  %s2423_s22 = smov 0  }
   0x5 LB: > { %3989 = sst [smem:[#allocation9_spill]] %s2367_s20  ;;  %s1950_s23 = sadd.s32 4294967295, %s2375_s22   ;;  %s2375_s22 = sphi %s2423_s22, %s17_s22   ;;  %s2371_s21 = sphi %s2421_s21, %s4201_s21   ;;  %s2367_s20 = sphi %s2419_s20, %s4200_s20   ;;  %s2363_s19 = sphi %s2417_s19, %s4199_s19   ;;  %s2359_s18 = sphi %s2415_s18, %s4198_s18   ;;  %s2355_s17 = sphi %s2413_s17, %s4204_s17   ;;  %s2351_s16 = sphi %s2411_s16, %s4203_s16   ;;  %s2347_s15 = sphi %s2409_s15, %s4202_s15  }
   0x6   : > { %3990 = sst [smem:[#allocation10_spill]] %s2371_s21  ;;  %s1951_s24 = sadd.s32 4294967294, %s2375_s22  }
   0x7   : > { %s26_s25 = sadd.s32 1, %s2367_s20  ;;  %s29_s26 = sadd.s32 1, %s2371_s21 }
   0x8   : > { %p27_p0 = scmp.ge.s32.totalorder %s26_s25, 2  ;;  %p150_p1 = scmp.ne.s32.totalorder %s2355_s17, %s2351_s16 }
   0x9   : > { %p151_p2 = scmp.eq.s32.totalorder %s1950_s23, 3  ;;  %p156_p4 = scmp.ne.s32.totalorder %s2351_s16, %s2347_s15 }
   0xa   : > { %s4206_s25 = smov (%p27_p0, %s26_s25), 0  ;;  %s4208_s26 = smov (!%p27_p0, %s29_s26), %s2371_s21 }
   0xb   : > { %3991 = sst [smem:[#allocation11_spill]] %s4206_s25  ;;  %p2458_p3 = por %p151_p2, %p150_p1 }
   0xc   : > { %p31_p5 = scmp.ge.s32.totalorder %s4208_s26, 2  ;;  %p157_p6 = scmp.eq.s32.totalorder %s1951_s24, 3 }
   0xd   : > { %p1954_p7 = scmp.ge.s32.totalorder %s2375_s22, 1  ;;  %p208_p8 = scmp.lt.s32.totalorder %s2375_s22, 5 }
   0xe   : > { %s4210_s26 = smov (%p31_p5, %s4208_s26), 0  ;;  %p2468_p9 = por %p157_p6, %p156_p4 }
   0xf   : > { %3993 = sst [smem:[#allocation12_spill]] %s4210_s26  ;;  %p209_p10 = pnand %p1954_p7, %p208_p8 }
  0x10   : > { %s137_s29 = ssub.s32 %s2371_s21, %s4210_s26  ;;  %s140_s30 = sadd.s32 1, %s2355_s17 }
  0x11   : > { %p138_p11 = scmp.eq.s32.totalorder %s137_s29, 0  ;;  %212 = sbr.rel (%p209_p10) target bundleno = 967 (0x3c7), region = 36 }
  0x13   : > { %s2476_s5 = scalar_select %p138_p11, %s2355_s17, %s140_s30  }
  0x16   : > { %s3935_s6 = sand.u32 1, %s2351_s16   ;;  %s1956_s7 = sshll.u32 %s2363_s19, 4 }
  0x17   : > { %s1955_s8 = sshll.u32 %s3935_s6, 7  ;;  %p248_p12 = scmp.lt.s32.totalorder %s1956_s7, 31 }
  0x18   : > { %p253_p13 = scmp.lt.s32.totalorder %s2359_s18, 1  ;;  %s1960_s11 = sshll.u32 %s2359_s18, 4 }
  0x19   : > { %s4212_s7 = smov (!%p248_p12, %s1956_s7), 31  ;;  %p263_p0 = scmp.lt.s32.totalorder %s1960_s11, 31 }
  0x1a   : > { %s2484_s9 = scalar_select %p253_p13, %s2359_s18, 1 }
  0x1b   : > { %s1957_s10 = sshll.u32 %s4212_s7, 3  ;;  %s4214_s11 = smov (!%p263_p0, %s1960_s11), 31 }
  0x1c   : > { %s2490_s14 = scalar_lea.vmem %s3929_s0, %s1957_s10  ;;  %s255_s29 = scalar_lea.vmem %s3930_s1, %s2484_s9 }
  0x1d   : > { %s2499_s6 = scalar_lea.vmem %s3931_s2, %s1957_s10  ;;  %s1961_s25 = sshll.u32 %s4214_s11, 3 }
  0x1e   : > { %s2504_s20 = scalar_lea.vmem %s3932_s3, %s1961_s25  ;;  %s2506_s12 = scalar_lea.vmem [#allocation6], %s1955_s8 }
  0x1f   : > { %p1962_p1 = scmp.ne.s32.totalorder %s2359_s18, 0 }
  0x21   : > { %272 = sbr.rel (%p1962_p1) target bundleno = 103 (0x67), region = 40 }
  0x26   : > { %vm273_vm0 = vcmask 7168   ;;  %v2377_v0 = vmov -inf   ;;  %v2378_v1 = vmov 0.0  }
  0x27   : > { %274 = vst.msk [vmem:[#allocation2] sm:$0xff] %vm273_vm0, %v2377_v0 }
  0x28   : > { %275 = vst.msk [vmem:[#allocation2 + $0x8] sm:$0xff] %vm273_vm0, %v2377_v0 }
  0x29   : > { %276 = vst.msk [vmem:[#allocation2 + $0x10] sm:$0xff] %vm273_vm0, %v2377_v0 }
  0x2a   : > { %277 = vst.msk [vmem:[#allocation2 + $0x18] sm:$0xff] %vm273_vm0, %v2377_v0 }
  0x2b   : > { %278 = vst.msk [vmem:[#allocation2 + $0x20] sm:$0xff] %vm273_vm0, %v2377_v0 }
  0x2c   : > { %279 = vst.msk [vmem:[#allocation2 + $0x28] sm:$0xff] %vm273_vm0, %v2377_v0 }
  0x2d   : > { %280 = vst.msk [vmem:[#allocation2 + $0x30] sm:$0xff] %vm273_vm0, %v2377_v0 }
  0x2e   : > { %281 = vst.msk [vmem:[#allocation2 + $0x38] sm:$0xff] %vm273_vm0, %v2377_v0 }
  0x2f   : > { %282 = vst.msk [vmem:[#allocation2 + $0x40] sm:$0xff] %vm273_vm0, %v2377_v0 }
  0x30   : > { %283 = vst.msk [vmem:[#allocation2 + $0x48] sm:$0xff] %vm273_vm0, %v2377_v0 }
  0x31   : > { %284 = vst.msk [vmem:[#allocation2 + $0x50] sm:$0xff] %vm273_vm0, %v2377_v0 }
  0x32   : > { %285 = vst.msk [vmem:[#allocation2 + $0x58] sm:$0xff] %vm273_vm0, %v2377_v0 }
  0x33   : > { %286 = vst.msk [vmem:[#allocation2 + $0x60] sm:$0xff] %vm273_vm0, %v2377_v0 }
  0x34   : > { %287 = vst.msk [vmem:[#allocation2 + $0x68] sm:$0xff] %vm273_vm0, %v2377_v0 }
  0x35   : > { %288 = vst.msk [vmem:[#allocation2 + $0x70] sm:$0xff] %vm273_vm0, %v2377_v0 }
  0x36   : > { %289 = vst.msk [vmem:[#allocation2 + $0x78] sm:$0xff] %vm273_vm0, %v2377_v0 }
  0x37   : > { %290 = vst.msk [vmem:[#allocation3] sm:$0xff] %vm273_vm0, %v2378_v1 }
  0x38   : > { %291 = vst.msk [vmem:[#allocation3 + $0x8] sm:$0xff] %vm273_vm0, %v2378_v1 }
  0x39   : > { %292 = vst.msk [vmem:[#allocation3 + $0x10] sm:$0xff] %vm273_vm0, %v2378_v1 }
  0x3a   : > { %293 = vst.msk [vmem:[#allocation3 + $0x18] sm:$0xff] %vm273_vm0, %v2378_v1 }
  0x3b   : > { %294 = vst.msk [vmem:[#allocation3 + $0x20] sm:$0xff] %vm273_vm0, %v2378_v1 }
  0x3c   : > { %295 = vst.msk [vmem:[#allocation3 + $0x28] sm:$0xff] %vm273_vm0, %v2378_v1 }
  0x3d   : > { %296 = vst.msk [vmem:[#allocation3 + $0x30] sm:$0xff] %vm273_vm0, %v2378_v1 }
  0x3e   : > { %297 = vst.msk [vmem:[#allocation3 + $0x38] sm:$0xff] %vm273_vm0, %v2378_v1 }
  0x3f   : > { %298 = vst.msk [vmem:[#allocation3 + $0x40] sm:$0xff] %vm273_vm0, %v2378_v1 }
  0x40   : > { %299 = vst.msk [vmem:[#allocation3 + $0x48] sm:$0xff] %vm273_vm0, %v2378_v1 }
  0x41   : > { %300 = vst.msk [vmem:[#allocation3 + $0x50] sm:$0xff] %vm273_vm0, %v2378_v1 }
  0x42   : > { %301 = vst.msk [vmem:[#allocation3 + $0x58] sm:$0xff] %vm273_vm0, %v2378_v1 }
  0x43   : > { %302 = vst.msk [vmem:[#allocation3 + $0x60] sm:$0xff] %vm273_vm0, %v2378_v1 }
  0x44   : > { %303 = vst.msk [vmem:[#allocation3 + $0x68] sm:$0xff] %vm273_vm0, %v2378_v1 }
  0x45   : > { %304 = vst.msk [vmem:[#allocation3 + $0x70] sm:$0xff] %vm273_vm0, %v2378_v1 }
  0x46   : > { %305 = vst.msk [vmem:[#allocation3 + $0x78] sm:$0xff] %vm273_vm0, %v2378_v1 }
  0x47   : > { %306 = vst.msk [vmem:[#allocation4] sm:$0xff] %vm273_vm0, %v2378_v1 }
  0x48   : > { %307 = vst.msk [vmem:[#allocation4 + $0x8] sm:$0xff] %vm273_vm0, %v2378_v1 }
  0x49   : > { %308 = vst.msk [vmem:[#allocation4 + $0x10] sm:$0xff] %vm273_vm0, %v2378_v1 }
  0x4a   : > { %309 = vst.msk [vmem:[#allocation4 + $0x18] sm:$0xff] %vm273_vm0, %v2378_v1 }
  0x4b   : > { %310 = vst.msk [vmem:[#allocation4 + $0x20] sm:$0xff] %vm273_vm0, %v2378_v1 }
  0x4c   : > { %311 = vst.msk [vmem:[#allocation4 + $0x28] sm:$0xff] %vm273_vm0, %v2378_v1 }
  0x4d   : > { %312 = vst.msk [vmem:[#allocation4 + $0x30] sm:$0xff] %vm273_vm0, %v2378_v1 }
  0x4e   : > { %313 = vst.msk [vmem:[#allocation4 + $0x38] sm:$0xff] %vm273_vm0, %v2378_v1 }
  0x4f   : > { %314 = vst.msk [vmem:[#allocation4 + $0x40] sm:$0xff] %vm273_vm0, %v2378_v1 }
  0x50   : > { %315 = vst.msk [vmem:[#allocation4 + $0x48] sm:$0xff] %vm273_vm0, %v2378_v1 }
  0x51   : > { %316 = vst.msk [vmem:[#allocation4 + $0x50] sm:$0xff] %vm273_vm0, %v2378_v1 }
  0x52   : > { %317 = vst.msk [vmem:[#allocation4 + $0x58] sm:$0xff] %vm273_vm0, %v2378_v1 }
  0x53   : > { %318 = vst.msk [vmem:[#allocation4 + $0x60] sm:$0xff] %vm273_vm0, %v2378_v1 }
  0x54   : > { %319 = vst.msk [vmem:[#allocation4 + $0x68] sm:$0xff] %vm273_vm0, %v2378_v1 }
  0x55   : > { %320 = vst.msk [vmem:[#allocation4 + $0x70] sm:$0xff] %vm273_vm0, %v2378_v1 }
  0x56   : > { %321 = vst.msk [vmem:[#allocation4 + $0x78] sm:$0xff] %vm273_vm0, %v2378_v1 }
  0x57   : > { %322 = vst.msk [vmem:[#allocation5] sm:$0xff] %vm273_vm0, %v2378_v1 }
  0x58   : > { %323 = vst.msk [vmem:[#allocation5 + $0x8] sm:$0xff] %vm273_vm0, %v2378_v1 }
  0x59   : > { %324 = vst.msk [vmem:[#allocation5 + $0x10] sm:$0xff] %vm273_vm0, %v2378_v1 }
  0x5a   : > { %325 = vst.msk [vmem:[#allocation5 + $0x18] sm:$0xff] %vm273_vm0, %v2378_v1 }
  0x5b   : > { %326 = vst.msk [vmem:[#allocation5 + $0x20] sm:$0xff] %vm273_vm0, %v2378_v1 }
  0x5c   : > { %327 = vst.msk [vmem:[#allocation5 + $0x28] sm:$0xff] %vm273_vm0, %v2378_v1 }
  0x5d   : > { %328 = vst.msk [vmem:[#allocation5 + $0x30] sm:$0xff] %vm273_vm0, %v2378_v1 }
  0x5e   : > { %329 = vst.msk [vmem:[#allocation5 + $0x38] sm:$0xff] %vm273_vm0, %v2378_v1 }
  0x5f   : > { %330 = vst.msk [vmem:[#allocation5 + $0x40] sm:$0xff] %vm273_vm0, %v2378_v1 }
  0x60   : > { %331 = vst.msk [vmem:[#allocation5 + $0x48] sm:$0xff] %vm273_vm0, %v2378_v1 }
  0x61   : > { %332 = vst.msk [vmem:[#allocation5 + $0x50] sm:$0xff] %vm273_vm0, %v2378_v1 }
  0x62   : > { %333 = vst.msk [vmem:[#allocation5 + $0x58] sm:$0xff] %vm273_vm0, %v2378_v1 }
  0x63   : > { %334 = vst.msk [vmem:[#allocation5 + $0x60] sm:$0xff] %vm273_vm0, %v2378_v1 }
  0x64   : > { %335 = vst.msk [vmem:[#allocation5 + $0x68] sm:$0xff] %vm273_vm0, %v2378_v1 }
  0x65   : > { %336 = vst.msk [vmem:[#allocation5 + $0x70] sm:$0xff] %vm273_vm0, %v2378_v1 }
  0x66   : > { %337 = vst.msk [vmem:[#allocation5 + $0x78] sm:$0xff] %vm273_vm0, %v2378_v1 }
  0x67 PF: > { %v588_v2 = vld [vmem:[%s2504_s20 + $0x78] sm:$0xff]  ;;  %vm589_vm1 = vcmask 261120   ;;  %v411_v3 = vld [vmem:[%s2490_s14] sm:$0xff]  ;;  %v413_v4 = vld [vmem:[%s2490_s14 + $0x10] sm:$0xff]  ;;  %v2379_v6 = vmov 0   ;;  %s1964_s21 = sshll.u32 %s2359_s18, 7 }
  0x68   : > { %1981 = vmatpush.xpose.msk.msra.mxu0 %vm589_vm1, %v588_v2  ;;  %2020 = vmatpush.xpose.msk.msra.mxu1 %vm589_vm1, %v588_v2  ;;  %v587_v5 = vld [vmem:[%s2504_s20 + $0x70] sm:$0xff]  ;;  %v415_v7 = vld [vmem:[%s2490_s14 + $0x20] sm:$0xff]  ;;  %v586_v8 = vld [vmem:[%s2504_s20 + $0x68] sm:$0xff]  ;;  %p2013_p2 = scmp.ne.s32.totalorder %s2359_s18, 1 }
  0x69   : > { %2021 = vmatpush.xpose.msk.msra.mxu2 %vm589_vm1, %v588_v2  ;;  %2022 = vmatpush.xpose.msk.msra.mxu3 %vm589_vm1, %v588_v2  ;;  %v412_v9 = vld [vmem:[%s2490_s14 + $0x8] sm:$0xff]  ;;  %v414_v10 = vld [vmem:[%s2490_s14 + $0x18] sm:$0xff]  ;;  %v585_v11 = vld [vmem:[%s2504_s20 + $0x60] sm:$0xff] }
  0x6a   : > { %2146 = vset.pattern.permute.xlu0 %v2379_v6  ;;  %2147 = vset.pattern.permute.xlu1 %v2379_v6  ;;  %v416_v12 = vld [vmem:[%s2490_s14 + $0x28] sm:$0xff]  ;;  %v584_v13 = vld [vmem:[%s2504_s20 + $0x58] sm:$0xff]  ;;  %v417_v14 = vld [vmem:[%s2490_s14 + $0x30] sm:$0xff] }
  0x6b   : > { %429 = vperm.xlu0 %2146, %v411_v3   ;;  %435 = vperm.xlu1 %2147, %v413_v4   ;;  %v418_v15 = vld [vmem:[%s2490_s14 + $0x38] sm:$0xff]  ;;  %v583_v16 = vld [vmem:[%s2504_s20 + $0x50] sm:$0xff]  ;;  %v419_v17 = vld [vmem:[%s2490_s14 + $0x40] sm:$0xff]  ;;  %v340_v4 = vlaneseq }
  0x6c   : > { %1982 = vmatpush.xpose.msk.msra.mxu0 %vm589_vm1, %v587_v5  ;;  %2023 = vmatpush.xpose.msk.msra.mxu1 %vm589_vm1, %v587_v5  ;;  %v582_v18 = vld [vmem:[%s2504_s20 + $0x48] sm:$0xff]  ;;  %v421_v20 = vld [vmem:[%s2490_s14 + $0x50] sm:$0xff]  ;;  %v581_v21 = vld [vmem:[%s2504_s20 + $0x40] sm:$0xff] }
  0x6d   : > { %2024 = vmatpush.xpose.msk.msra.mxu2 %vm589_vm1, %v587_v5  ;;  %2025 = vmatpush.xpose.msk.msra.mxu3 %vm589_vm1, %v587_v5  ;;  %v420_v19 = vld [vmem:[%s2490_s14 + $0x48] sm:$0xff]  ;;  %v422_v22 = vld [vmem:[%s2490_s14 + $0x58] sm:$0xff]  ;;  %v423_v24 = vld [vmem:[%s2490_s14 + $0x60] sm:$0xff]  ;;  %v2705_v5 = vshrl.u32 %v340_v4, 7 }
  0x6e   : > { %2148 = vset.pattern.permute.xlu2 %v2379_v6  ;;  %v580_v23 = vld [vmem:[%s2504_s20 + $0x38] sm:$0xff]  ;;  %v424_v25 = vld [vmem:[%s2490_s14 + $0x68] sm:$0xff]  ;;  %v579_v26 = vld [vmem:[%s2504_s20 + $0x30] sm:$0xff]  ;;  %v375_v6 = vand.u32 127, %v340_v4 }
  0x6f   : > { %441 = vperm.xlu2 %2148, %v415_v7   ;;  %v425_v27 = vld [vmem:[%s2490_s14 + $0x70] sm:$0xff]  ;;  %v578_v28 = vld [vmem:[%s2504_s20 + $0x28] sm:$0xff]  ;;  %v426_v29 = vld [vmem:[%s2490_s14 + $0x78] sm:$0xff] }
  0x70   : > { %1983 = vmatpush.xpose.msk.msra.mxu0 %vm589_vm1, %v586_v8  ;;  %2026 = vmatpush.xpose.msk.msra.mxu1 %vm589_vm1, %v586_v8  ;;  %v577_v30 = vld [vmem:[%s2504_s20 + $0x20] sm:$0xff]  ;;  %v576_v31 = vld [vmem:[%s2504_s20 + $0x18] sm:$0xff]  ;;  %v575_v32 = vld [vmem:[%s2504_s20 + $0x10] sm:$0xff] }
  0x71   : > { %2027 = vmatpush.xpose.msk.msra.mxu2 %vm589_vm1, %v586_v8  ;;  %2028 = vmatpush.xpose.msk.msra.mxu3 %vm589_vm1, %v586_v8  ;;  %v574_v33 = vld [vmem:[%s2504_s20 + $0x8] sm:$0xff]  ;;  %v541_v34 = vld [vmem:[%s2499_s6] sm:$0xff]  ;;  %v543_v51 = vld [vmem:[%s2499_s6 + $0x10] sm:$0xff] }
  0x72   : > { %v545_v35 = vld [vmem:[%s2499_s6 + $0x20] sm:$0xff]  ;;  %v557_v39 = vmul.f32 14.285714, %v541_v34  ;;  %v542_v43 = vld [vmem:[%s2499_s6 + $0x8] sm:$0xff]  ;;  %v547_v52 = vld [vmem:[%s2499_s6 + $0x30] sm:$0xff] }
  0x73   : > { %432 = vperm.xlu0 %2146, %v412_v9   ;;  %438 = vperm.xlu1 %2147, %v414_v10   ;;  %v573_v36 = vld [vmem:[%s2504_s20] sm:$0xff]  ;;  %v561_v40 = vmul.f32 14.285714, %v545_v35  ;;  %v546_v44 = vld [vmem:[%s2499_s6 + $0x28] sm:$0xff]  ;;  %v558_v47 = vmul.f32 14.285714, %v542_v43  ;;  %v376_v9 = vstv %s1964_s21 }
  0x74   : > { %1984 = vmatpush.xpose.msk.msra.mxu0 %vm589_vm1, %v585_v11  ;;  %2029 = vmatpush.xpose.msk.msra.mxu1 %vm589_vm1, %v585_v11  ;;  %v549_v37 = vld [vmem:[%s2499_s6 + $0x40] sm:$0xff]  ;;  %v550_v45 = vld [vmem:[%s2499_s6 + $0x48] sm:$0xff]  ;;  %v562_v48 = vmul.f32 14.285714, %v546_v44  ;;  %v551_v53 = vld [vmem:[%s2499_s6 + $0x50] sm:$0xff]  ;;  %s1963_s20 = sshll.u32 %s2363_s19, 7 }
  0x75   : > { %2030 = vmatpush.xpose.msk.msra.mxu2 %vm589_vm1, %v585_v11  ;;  %2031 = vmatpush.xpose.msk.msra.mxu3 %vm589_vm1, %v585_v11  ;;  %v553_v38 = vld [vmem:[%s2499_s6 + $0x60] sm:$0xff]  ;;  %v565_v41 = vmul.f32 14.285714, %v549_v37  ;;  %v554_v46 = vld [vmem:[%s2499_s6 + $0x68] sm:$0xff]  ;;  %v566_v49 = vmul.f32 14.285714, %v550_v45  ;;  %v2709_v8 = vstv %s1963_s20 }
  0x76   : > { %v569_v42 = vmul.f32 14.285714, %v553_v38  ;;  %v570_v50 = vmul.f32 14.285714, %v554_v46  ;;  %v555_v54 = vld [vmem:[%s2499_s6 + $0x70] sm:$0xff]  ;;  %v544_v59 = vld [vmem:[%s2499_s6 + $0x18] sm:$0xff] }
  0x77   : > { %444 = vperm.xlu2 %2148, %v416_v12   ;;  %v559_v55 = vmul.f32 14.285714, %v543_v51  ;;  %v563_v56 = vmul.f32 14.285714, %v547_v52  ;;  %v567_v57 = vmul.f32 14.285714, %v551_v53  ;;  %v2715_v12 = vadd.s32 %v2709_v8, %v2705_v5 }
  0x78   : > { %1985 = vmatpush.xpose.msk.msra.mxu0 %vm589_vm1, %v584_v13  ;;  %2032 = vmatpush.xpose.msk.msra.mxu1 %vm589_vm1, %v584_v13  ;;  %v571_v58 = vmul.f32 14.285714, %v555_v54  ;;  %v548_v60 = vld [vmem:[%s2499_s6 + $0x38] sm:$0xff]  ;;  %v560_v63 = vmul.f32 14.285714, %v544_v59  ;;  %v343_v10 = vadd.s32 16, %v2705_v5 }
  0x79   : > { %2033 = vmatpush.xpose.msk.msra.mxu2 %vm589_vm1, %v584_v13  ;;  %2034 = vmatpush.xpose.msk.msra.mxu3 %vm589_vm1, %v584_v13  ;;  %v552_v61 = vld [vmem:[%s2499_s6 + $0x58] sm:$0xff]  ;;  %v564_v0 = vmul.f32 14.285714, %v548_v60  ;;  %v342_v11 = vadd.s32 8, %v2705_v5  ;;  %3995 = vst [vmem:[#allocation13_spill] sm:$0xff] %v2715_v12  ;;  %v2717_v13 = vadd.s32 %v376_v9, %v375_v6  ;;  %v4014_v43 = vmov 0 }
  0x7a   : > { %v556_v62 = vld [vmem:[%s2499_s6 + $0x78] sm:$0xff]  ;;  %v568_v1 = vmul.f32 14.285714, %v552_v61  ;;  %v352_v51 = vadd.s32 88, %v2705_v5  ;;  %v350_v53 = vadd.s32 72, %v2705_v5  ;;  %v4025_v59 = vmov 0 }
  0x7b   : > { %447 = vperm.xlu0 %2146, %v417_v14   ;;  %450 = vperm.xlu1 %2147, %v418_v15   ;;  %v572_v2 = vmul.f32 14.285714, %v556_v62  ;;  %v346_v14 = vadd.s32 40, %v2705_v5  ;;  %v2721_v15 = vadd.s32 %v2709_v8, %v343_v10  ;;  %vm3938_vm2 = vcmp.lt.s32.totalorder %v2717_v13, 200 }
  0x7c   : > { %1986 = vmatpush.xpose.msk.msra.mxu0 %vm589_vm1, %v583_v16  ;;  %2035 = vmatpush.xpose.msk.msra.mxu1 %vm589_vm1, %v583_v16  ;;  %vm379_vm3 = vcmp.ne.s32.totalorder %v2715_v12, %v2717_v13  ;;  %v2907_v60 = vadd.s32 %v2709_v8, %v352_v51  ;;  %v2910_v61 = vadd.s32 %v2709_v8, %v350_v53  ;;  %v4030_v6 = vmov 0  ;;  %v3269_v12 = vld [vmem:[#allocation2 + $0x30] sm:$0xff] }
  0x7d   : > { %2036 = vmatpush.xpose.msk.msra.mxu2 %vm589_vm1, %v583_v16  ;;  %2037 = vmatpush.xpose.msk.msra.mxu3 %vm589_vm1, %v583_v16  ;;  %3996 = vst [vmem:[#allocation14_spill] sm:$0xff] %v2721_v15  ;;  %v2724_v16 = vadd.s32 %v2709_v8, %v342_v11  ;;  %vm381_vm4 = vcmp.ne.s32.totalorder %v2721_v15, %v2717_v13  ;;  %vm2752_vm6 = vmand %vm3938_vm2, %vm379_vm3  ;;  %v353_v11 = vadd.s32 96, %v2705_v5 }
  0x7e   : > { %vm2761_vm7 = vmand %vm3938_vm2, %vm381_vm4  ;;  %4027 = vst [vmem:[#allocation25_spill] sm:$0xff] %v2907_v60 }
  0x7f   : > { %453 = vperm.xlu2 %2148, %v419_v17   ;;  %3997 = vst [vmem:[#allocation15_spill] sm:$0xff] %v2724_v16  ;;  %v345_v17 = vadd.s32 32, %v2705_v5  ;;  %vm380_vm5 = vcmp.ne.s32.totalorder %v2724_v16, %v2717_v13 }
  0x80   : > { %1987 = vmatpush.xpose.msk.msra.mxu0 %vm589_vm1, %v582_v18  ;;  %2038 = vmatpush.xpose.msk.msra.mxu1 %vm589_vm1, %v582_v18  ;;  %vm2772_vm11 = vmand %vm3938_vm2, %vm380_vm5  ;;  %4028 = vst [vmem:[#allocation26_spill] sm:$0xff] %v2910_v61 }
  0x81   : > { %2039 = vmatpush.xpose.msk.msra.mxu2 %vm589_vm1, %v582_v18  ;;  %2040 = vmatpush.xpose.msk.msra.mxu3 %vm589_vm1, %v582_v18  ;;  %v344_v18 = vadd.s32 24, %v2705_v5  ;;  %4070 = vst [vmem:[#allocation32_spill] sm:$0xff] %v3269_v12 }
  0x83   : > { %456 = vperm.xlu0 %2146, %v420_v19   ;;  %459 = vperm.xlu1 %2147, %v421_v20   ;;  %v2734_v20 = vadd.s32 %v2709_v8, %v346_v14 }
  0x84   : > { %1988 = vmatpush.xpose.msk.msra.mxu0 %vm589_vm1, %v581_v21  ;;  %2041 = vmatpush.xpose.msk.msra.mxu1 %vm589_vm1, %v581_v21 }
  0x85   : > { %2042 = vmatpush.xpose.msk.msra.mxu2 %vm589_vm1, %v581_v21  ;;  %2043 = vmatpush.xpose.msk.msra.mxu3 %vm589_vm1, %v581_v21  ;;  %3998 = vst [vmem:[#allocation16_spill] sm:$0xff] %v2734_v20  ;;  %v2741_v21 = vld [vmem:[%s255_s29] ss:$0 sm:$0xff]  ;;  %vm384_vm8 = vcmp.ne.s32.totalorder %v2734_v20, %v2717_v13 }
  0x87   : > { %462 = vperm.xlu2 %2148, %v422_v22   ;;  %v2748_v22 = vadd.s32 %v2709_v8, %v345_v17 }
  0x88   : > { %1989 = vmatpush.xpose.msk.msra.mxu0 %vm589_vm1, %v580_v23  ;;  %2044 = vmatpush.xpose.msk.msra.mxu1 %vm589_vm1, %v580_v23 }
  0x89   : > { %2045 = vmatpush.xpose.msk.msra.mxu2 %vm589_vm1, %v580_v23  ;;  %2046 = vmatpush.xpose.msk.msra.mxu3 %vm589_vm1, %v580_v23  ;;  %3999 = vst [vmem:[#allocation17_spill] sm:$0xff] %v2748_v22  ;;  %vm383_vm13 = vcmp.ne.s32.totalorder %v2748_v22, %v2717_v13 }
  0x8a   : > { %vm2821_vm4 = vmand %vm3938_vm2, %vm383_vm13 }
  0x8b   : > { %465 = vperm.xlu0 %2146, %v423_v24   ;;  %468 = vperm.xlu1 %2147, %v424_v25   ;;  %v2757_v24 = vadd.s32 %v2709_v8, %v344_v18 }
  0x8c   : > { %1990 = vmatpush.xpose.msk.msra.mxu0 %vm589_vm1, %v579_v26  ;;  %2047 = vmatpush.xpose.msk.msra.mxu1 %vm589_vm1, %v579_v26 }
  0x8d   : > { %2048 = vmatpush.xpose.msk.msra.mxu2 %vm589_vm1, %v579_v26  ;;  %2049 = vmatpush.xpose.msk.msra.mxu3 %vm589_vm1, %v579_v26  ;;  %4002 = vst [vmem:[#allocation18_spill] sm:$0xff] %v2757_v24  ;;  %vm382_vm15 = vcmp.ne.s32.totalorder %v2757_v24, %v2717_v13 }
  0x8f   : > { %471 = vperm.xlu2 %2148, %v425_v27   ;;  %v4003_v27 = vmov 0 }
  0x90   : > { %1991 = vmatpush.xpose.msk.msra.mxu0 %vm589_vm1, %v578_v28  ;;  %2050 = vmatpush.xpose.msk.msra.mxu1 %vm589_vm1, %v578_v28  ;;  %v4004_v27 = vsel %vm2761_vm7, 4294967295, %v4003_v27 }
  0x91   : > { %2051 = vmatpush.xpose.msk.msra.mxu2 %vm589_vm1, %v578_v28  ;;  %2052 = vmatpush.xpose.msk.msra.mxu3 %vm589_vm1, %v578_v28  ;;  %v349_v28 = vadd.s32 64, %v2705_v5 }
  0x93   : > { %474 = vperm.xlu0 %2146, %v426_v29  }
  0x94   : > { %1992 = vmatpush.xpose.msk.msra.mxu0 %vm589_vm1, %v577_v30  ;;  %2053 = vmatpush.xpose.msk.msra.mxu1 %vm589_vm1, %v577_v30 }
  0x95   : > { %2054 = vmatpush.xpose.msk.msra.mxu2 %vm589_vm1, %v577_v30  ;;  %2055 = vmatpush.xpose.msk.msra.mxu3 %vm589_vm1, %v577_v30  ;;  %v355_v30 = vadd.s32 112, %v2705_v5 }
  0x97   : > { %v2791_v35 = vadd.s32 %v2709_v8, %v355_v30 }
  0x98   : > { %1993 = vmatpush.xpose.msk.msra.mxu0 %vm589_vm1, %v576_v31  ;;  %2056 = vmatpush.xpose.msk.msra.mxu1 %vm589_vm1, %v576_v31 }
  0x99   : > { %2057 = vmatpush.xpose.msk.msra.mxu2 %vm589_vm1, %v576_v31  ;;  %2058 = vmatpush.xpose.msk.msra.mxu3 %vm589_vm1, %v576_v31  ;;  %v354_v31 = vadd.s32 104, %v2705_v5  ;;  %4007 = vst [vmem:[#allocation19_spill] sm:$0xff] %v2791_v35  ;;  %vm393_vm5 = vcmp.ne.s32.totalorder %v2791_v35, %v2717_v13 }
  0x9c   : > { %1994 = vmatpush.xpose.msk.msra.mxu0 %vm589_vm1, %v575_v32  ;;  %2059 = vmatpush.xpose.msk.msra.mxu1 %vm589_vm1, %v575_v32 }
  0x9d   : > { %2060 = vmatpush.xpose.msk.msra.mxu2 %vm589_vm1, %v575_v32  ;;  %2061 = vmatpush.xpose.msk.msra.mxu3 %vm589_vm1, %v575_v32  ;;  %v347_v32 = vadd.s32 48, %v2705_v5 }
  0x9f   : > { %v2842_v44 = vadd.s32 %v2709_v8, %v347_v32 }
  0xa0   : > { %1995 = vmatpush.xpose.msk.msra.mxu0 %vm589_vm1, %v574_v33  ;;  %2062 = vmatpush.xpose.msk.msra.mxu1 %vm589_vm1, %v574_v33 }
  0xa1   : > { %2063 = vmatpush.xpose.msk.msra.mxu2 %vm589_vm1, %v574_v33  ;;  %2064 = vmatpush.xpose.msk.msra.mxu3 %vm589_vm1, %v574_v33  ;;  %v2380_v33 = vmov 0.0   ;;  %4016 = vst [vmem:[#allocation22_spill] sm:$0xff] %v2842_v44  ;;  %vm385_vm13 = vcmp.ne.s32.totalorder %v2842_v44, %v2717_v13  ;;  %v3215_v44 = vld [vmem:[#allocation2 + $0x8] sm:$0xff] }
  0xa4   : > { %1996 = vmatpush.xpose.msk.msra.mxu0 %vm589_vm1, %v573_v36  ;;  %2065 = vmatpush.xpose.msk.msra.mxu1 %vm589_vm1, %v573_v36 }
  0xa5   : > { %2066 = vmatpush.xpose.msk.msra.mxu2 %vm589_vm1, %v573_v36  ;;  %2067 = vmatpush.xpose.msk.msra.mxu3 %vm589_vm1, %v573_v36  ;;  %v2794_v36 = vadd.s32 %v2709_v8, %v354_v31 }
  0xa7   : > { %1997 = vmatmul.msk.f32.vlgmr.msra.gmra.mxu0 %vm589_vm1, %v557_v39  ;;  %2001 = vmatmul.msk.f32.vlgmr.msra.gmra.mxu1 %vm589_vm1, %v561_v40  ;;  %4008 = vst [vmem:[#allocation20_spill] sm:$0xff] %v2794_v36  ;;  %v356_v40 = vadd.s32 120, %v2705_v5 }
  0xa8   : > { %2005 = vmatmul.msk.f32.vlgmr.msra.gmra.mxu2 %vm589_vm1, %v565_v41  ;;  %2009 = vmatmul.msk.f32.vlgmr.msra.gmra.mxu3 %vm589_vm1, %v569_v42  ;;  %v2826_v42 = vadd.s32 %v2709_v8, %v349_v28 }
  0xa9   : > { %v2845_v45 = vadd.s32 %v2709_v8, %v356_v40 }
  0xaa   : > { %4013 = vst [vmem:[#allocation21_spill] sm:$0xff] %v2826_v42 }
  0xab   : > { %4017 = vst [vmem:[#allocation23_spill] sm:$0xff] %v2845_v45 }
  0xaf   : > { %1998 = vmatmul.msk.f32.gmra.mxu0 %vm589_vm1, %v558_v47  ;;  %2002 = vmatmul.msk.f32.gmra.mxu1 %vm589_vm1, %v562_v48 }
  0xb0   : > { %2006 = vmatmul.msk.f32.gmra.mxu2 %vm589_vm1, %v566_v49  ;;  %2010 = vmatmul.msk.f32.gmra.mxu3 %vm589_vm1, %v570_v50  ;;  %v348_v49 = vadd.s32 56, %v2705_v5  ;;  %v4020_v50 = vmov 0 }
  0xb7   : > { %1999 = vmatmul.msk.f32.gmra.mxu0 %vm589_vm1, %v559_v55  ;;  %2003 = vmatmul.msk.f32.gmra.mxu1 %vm589_vm1, %v563_v56 }
  0xb8   : > { %2007 = vmatmul.msk.f32.gmra.mxu2 %vm589_vm1, %v567_v57  ;;  %2011 = vmatmul.msk.f32.gmra.mxu3 %vm589_vm1, %v571_v58  ;;  %v2895_v57 = vadd.s32 %v2709_v8, %v348_v49 }
  0xba   : > { %4024 = vst [vmem:[#allocation24_spill] sm:$0xff] %v2895_v57 }
  0xbf   : > { %2000 = vmatmul.msk.f32.gmra.mxu0 %vm589_vm1, %v560_v63  ;;  %2004 = vmatmul.msk.f32.gmra.mxu1 %vm589_vm1, %v564_v0 }
  0xc0   : > { %2008 = vmatmul.msk.f32.gmra.mxu2 %vm589_vm1, %v568_v1  ;;  %2012 = vmatmul.msk.f32.gmra.mxu3 %vm589_vm1, %v572_v2  ;;  %vm2806_vm1 = vmand %vm3938_vm2, %vm384_vm8  ;;  %v351_v1 = vadd.s32 80, %v2705_v5 }
  0xc1   : > { %vm2864_vm8 = vmand %vm3938_vm2, %vm393_vm5 }
  0xc2   : > { %v4021_v50 = vsel %vm2864_vm8, 4294967295, %v4020_v50  ;;  %v2957_v9 = vadd.s32 %v2709_v8, %v351_v1 }
  0xc4   : > { %4035 = vst [vmem:[#allocation27_spill] sm:$0xff] %v2957_v9 }
  0xc9   : > { %v2701_v3 = vpop.permute.xlu2 %441 }
  0xca   : > { %vm481_vm3 = vcmp.eq.s32.totalorder %v2701_v3, %v2741_v21 }
  0xd1   : > { %v445_v7 = vpop.permute.xlu2 %444 }
  0xd2   : > { %vm482_vm0 = vcmp.eq.s32.totalorder %v445_v7, %v2741_v21  ;;  %v4033_v7 = vmov 0 }
  0xd9   : > { %v2731_v19 = vpop.permute.xlu2 %453 }
  0xdd   : > { %v430_v25 = vpop.permute.xlu0 %429  ;;  %v436_v26 = vpop.permute.xlu1 %435 }
  0xde   : > { %vm477_vm9 = vcmp.eq.s32.totalorder %v430_v25, %v2741_v21  ;;  %vm479_vm10 = vcmp.eq.s32.totalorder %v436_v26, %v2741_v21 }
  0xdf   : > { %vm493_vm12 = vmand %vm477_vm9, %vm2752_vm6 }
  0xe0   : > { %v2784_v34 = vsel %vm493_vm12, 1.0, %v2380_v33  ;;  %vm495_vm14 = vmand %vm479_vm10, %vm2761_vm7 }
  0xe1   : > { %1248 = vadd.xlane.f32.xlu1 %v2784_v34  ;;  %v2799_v37 = vsel %vm495_vm14, 1.0, %v2380_v33  ;;  %v2810_v39 = vpop.permute.xlu2 %462  ;;  %vm2837_vm9 = vmand %vm3938_vm2, %vm382_vm15 }
  0xe2   : > { %1252 = vadd.xlane.f32.xlu2 %v2799_v37  ;;  %v4015_v43 = vsel %vm2837_vm9, 4294967295, %v4014_v43  ;;  %vm498_vm10 = vmand %vm482_vm0, %vm2806_vm1  ;;  %vm387_vm0 = vcmp.ne.s32.totalorder %v2826_v42, %v2717_v13 }
  0xe3   : > { %vm2851_vm12 = vmand %vm481_vm3, %vm2821_vm4  ;;  %v2872_v52 = vsel %vm498_vm10, 1.0, %v2380_v33  ;;  %vm485_vm10 = vcmp.eq.s32.totalorder %v2731_v19, %v2741_v21  ;;  %v2979_v19 = vadd.s32 %v2709_v8, %v353_v11 }
  0xe4   : > { %v2926_v2 = vsel %vm2851_vm12, 1.0, %v2380_v33  ;;  %vm4029_vm12 = vcmp.lt.s32.totalorder %v2717_v13, 200 }
  0xe5   : > { %v433_v46 = vpop.permute.xlu0 %432  ;;  %v439_v47 = vpop.permute.xlu1 %438  ;;  %4039 = vst [vmem:[#allocation28_spill] sm:$0xff] %v2979_v19 }
  0xe6   : > { %vm478_vm14 = vcmp.eq.s32.totalorder %v433_v46, %v2741_v21  ;;  %vm480_vm15 = vcmp.eq.s32.totalorder %v439_v47, %v2741_v21 }
  0xe7   : > { %vm494_vm3 = vmand %vm478_vm14, %vm2772_vm11 }
  0xe8   : > { %v2878_v54 = vsel %vm494_vm3, 1.0, %v2380_v33  ;;  %vm496_vm5 = vmand %vm480_vm15, %vm2837_vm9 }
  0xe9   : > { %1250 = vadd.xlane.f32.xlu0 %v2878_v54  ;;  %v2884_v55 = vsel %vm496_vm5, 1.0, %v2380_v33  ;;  %vm2890_vm14 = vmand %vm3938_vm2, %vm387_vm0  ;;  %v472_v58 = vpop.permute.xlu2 %471 }
  0xea   : > { %1254 = vadd.xlane.f32.xlu1 %v2884_v55  ;;  %1258 = vadd.xlane.f32.xlu2 %v2872_v52  ;;  %vm2901_vm15 = vmand %vm3938_vm2, %vm385_vm13  ;;  %vm491_vm3 = vcmp.eq.s32.totalorder %v472_v58, %v2741_v21  ;;  %vm386_vm13 = vcmp.ne.s32.totalorder %v2895_v57, %v2717_v13 }
  0xeb   : > { %v4026_v59 = vsel %vm2901_vm15, 4294967295, %v4025_v59  ;;  %vm507_vm0 = vmand %vm491_vm3, %vm2864_vm8 }
  0xec   : > { %vm501_vm5 = vmand %vm485_vm10, %vm2890_vm14  ;;  %v2917_v62 = vsel %vm507_vm0, 1.0, %v2380_v33  ;;  %vm390_vm10 = vcmp.ne.s32.totalorder %v2907_v60, %v2717_v13  ;;  %vm388_vm0 = vcmp.ne.s32.totalorder %v2910_v61, %v2717_v13 }
  0xed   : > { %v448_v63 = vpop.permute.xlu0 %447  ;;  %v451_v0 = vpop.permute.xlu1 %450  ;;  %v2933_v3 = vsel %vm501_vm5, 1.0, %v2380_v33  ;;  %vm2943_vm8 = vmand %vm4029_vm12, %vm386_vm13 }
  0xee   : > { %vm483_vm2 = vcmp.eq.s32.totalorder %v448_v63, %v2741_v21  ;;  %vm484_vm9 = vcmp.eq.s32.totalorder %v451_v0, %v2741_v21  ;;  %v4031_v6 = vsel %vm2943_vm8, 4294967295, %v4030_v6  ;;  %vm4032_vm5 = vmmov %vm4029_vm12 }
  0xef   : > { %vm499_vm3 = vmand %vm483_vm2, %vm2901_vm15  ;;  %vm488_vm2 = vcmp.eq.s32.totalorder %v2810_v39, %v2741_v21 }
  0xf0   : > { %v2939_v4 = vsel %vm499_vm3, 1.0, %v2380_v33  ;;  %vm2952_vm15 = vmand %vm4032_vm5, %vm390_vm10 }
  0xf1   : > { %1256 = vadd.xlane.f32.xlu0 %v2926_v2  ;;  %v4034_v7 = vsel %vm2952_vm15, 4294967295, %v4033_v7  ;;  %vm4036_vm13 = vmmov %vm4032_vm5  ;;  %vm389_vm5 = vcmp.ne.s32.totalorder %v2957_v9, %v2717_v13  ;;  %v1137_v9 = vld [vmem:[#allocation4 + $0x8] sm:$0xff] }
  0xf2   : > { %1260 = vadd.xlane.f32.xlu1 %v2939_v4  ;;  %1264 = vadd.xlane.f32.xlu2 %v2933_v3  ;;  %vm2963_vm3 = vmand %vm4036_vm13, %vm388_vm0 }
  0xf3   : > { %vm500_vm10 = vmand %vm484_vm9, %vm2943_vm8 }
  0xf4   : > { %vm504_vm12 = vmand %vm488_vm2, %vm2952_vm15  ;;  %v2976_v18 = vsel %vm500_vm10, 1.0, %v2380_v33 }
  0xf5   : > { %v457_v14 = vpop.permute.xlu0 %456  ;;  %v460_v17 = vpop.permute.xlu1 %459  ;;  %v2984_v5 = vsel %vm504_vm12, 1.0, %v2380_v33  ;;  %vm4040_vm2 = vmmov %vm4036_vm13  ;;  %vm4043_vm12 = vcmp.ne.s32.totalorder %v2794_v36, %v2717_v13 }
  0xf6   : > { %vm486_vm7 = vcmp.eq.s32.totalorder %v457_v14, %v2741_v21  ;;  %vm487_vm9 = vcmp.eq.s32.totalorder %v460_v17, %v2741_v21  ;;  %vm2992_vm13 = vmand %vm4040_vm2, %vm389_vm5 }
  0xf7   : > { %vm502_vm0 = vmand %vm486_vm7, %vm2963_vm3  ;;  %vm391_vm7 = vcmp.ne.s32.totalorder %v2979_v19, %v2717_v13  ;;  %v1235_v19 = vld [vmem:[#allocation5 + $0x18] sm:$0xff] }
  0xf8   : > { %v2988_v25 = vsel %vm502_vm0, 1.0, %v2380_v33  ;;  %vm503_vm10 = vmand %vm487_vm9, %vm2992_vm13 }
  0xf9   : > { %1262 = vadd.xlane.f32.xlu0 %v2976_v18  ;;  %vm4044_vm5 = vmmov %vm4040_vm2  ;;  %v3021_v32 = vsel %vm503_vm10, 1.0, %v2380_v33 }
  0xfa   : > { %1266 = vadd.xlane.f32.xlu1 %v2988_v25  ;;  %1270 = vadd.xlane.f32.xlu2 %v2984_v5  ;;  %vm3008_vm0 = vmand %vm4044_vm5, %vm4043_vm12 }
  0xfb   : > { %vm3014_vm8 = vmand %vm4040_vm2, %vm391_vm7  ;;  %vm4049_vm7 = vcmp.ne.s32.totalorder %v2845_v45, %v2717_v13 }
  0xfc   : > { %vm4050_vm10 = vmmov %vm4040_vm2 }
  0xfd   : > { %v466_v28 = vpop.permute.xlu0 %465  ;;  %v469_v30 = vpop.permute.xlu1 %468  ;;  %vm3037_vm2 = vmand %vm4050_vm10, %vm4049_vm7 }
  0xfe   : > { %vm489_vm15 = vcmp.eq.s32.totalorder %v466_v28, %v2741_v21  ;;  %vm490_vm9 = vcmp.eq.s32.totalorder %v469_v30, %v2741_v21 }
  0xff   : > { %vm506_vm12 = vmand %vm490_vm9, %vm3008_vm0 }
 0x100   : > { %vm505_vm5 = vmand %vm489_vm15, %vm3014_vm8  ;;  %v3028_v39 = vsel %vm506_vm12, 1.0, %v2380_v33 }
 0x101   : > { %1268 = vadd.xlane.f32.xlu0 %v3021_v32  ;;  %v1977_v40 = vsel %vm505_vm5, 1.0, %v2380_v33  ;;  %vm4053_vm12 = vmmov %vm4050_vm10 }
 0x102   : > { %1272 = vadd.xlane.f32.xlu1 %v1977_v40  ;;  %vm4054_vm5 = vmmov %vm4050_vm10 }
 0x103   : > { %vm4055_vm7 = vmmov %vm4054_vm5 }
 0x104   : > { %vm4056_vm10 = vmmov %vm4054_vm5 }
 0x105   : > { %v475_v47 = vpop.permute.xlu0 %474 }
 0x106   : > { %vm492_vm15 = vcmp.eq.s32.totalorder %v475_v47, %v2741_v21 }
 0x107   : > { %vm508_vm9 = vmand %vm492_vm15, %vm3037_vm2 }
 0x108   : > { %v3045_v48 = vsel %vm508_vm9, 1.0, %v2380_v33  ;;  %vm4057_vm15 = vmmov %vm4054_vm5 }
 0x109   : > { %vm4058_vm9 = vmmov %vm4054_vm5 }
 0x124   : > { %v3047_v49 = vpop.f32.mrf.mxu0  ;;  %v3054_v58 = vpop.f32.mrf.mxu1 }
 0x125   : > { %v751_v51 = vsel %vm4053_vm12, %v3047_v49, -inf  ;;  %v1152_v53 = vmul.f32 %v2784_v34, %v3047_v49  ;;  %v755_v33 = vsel %vm4054_vm5, %v3054_v58, -inf  ;;  %v1156_v11 = vmul.f32 %v2926_v2, %v3054_v58  ;;  %vm4059_vm12 = vmmov %vm4054_vm5 }
 0x126   : > { %783 = vmax.xlane.f32.xlu1 %v751_v51 }
 0x127   : > { %1168 = vadd.xlane.f32.xlu2 %v1152_v53 }
 0x12b   : > { %v3056_v21 = vpop.f32.mrf.mxu2  ;;  %v3058_v63 = vpop.f32.mrf.mxu3 }
 0x12c   : > { %v763_v0 = vsel %vm4055_vm7, %v3058_v63, -inf  ;;  %v759_v34 = vsel %vm4056_vm10, %v3056_v21, -inf  ;;  %v1160_v1 = vmul.f32 %v2933_v3, %v3056_v21  ;;  %v1164_v14 = vmul.f32 %v1977_v40, %v3058_v63  ;;  %v3074_v17 = vpop.f32.mrf.mxu1  ;;  %v3076_v28 = vpop.f32.mrf.mxu0  ;;  %vm4060_vm7 = vmmov %vm4054_vm5 }
 0x12d   : > { %807 = vmax.xlane.f32.xlu0 %v763_v0  ;;  %v1157_v30 = vmul.f32 %v2872_v52, %v3074_v17  ;;  %v1153_v47 = vmul.f32 %v2878_v54, %v3076_v28  ;;  %v752_v3 = vsel %vm4057_vm15, %v3076_v28, -inf  ;;  %v756_v54 = vsel %vm4054_vm5, %v3074_v17, -inf  ;;  %vm4061_vm10 = vmmov %vm4054_vm5 }
 0x12e   : > { %791 = vmax.xlane.f32.xlu1 %v755_v33  ;;  %vm4062_vm15 = vmmov %vm4054_vm5 }
 0x12f   : > { %799 = vmax.xlane.f32.xlu2 %v759_v34 }
 0x133   : > { %v3085_v2 = vpop.f32.mrf.mxu2  ;;  %v3087_v40 = vpop.f32.mrf.mxu3 }
 0x134   : > { %v760_v51 = vsel %vm4058_vm9, %v3085_v2, -inf  ;;  %v764_v52 = vsel %vm4059_vm12, %v3087_v40, -inf  ;;  %v3098_v53 = vpop.f32.mrf.mxu0  ;;  %v1165_v0 = vmul.f32 %v3028_v39, %v3087_v40  ;;  %v1161_v34 = vmul.f32 %v2988_v25, %v3085_v2  ;;  %vm4063_vm12 = vmmov %vm4054_vm5 }
 0x135   : > { %1184 = vadd.xlane.f32.xlu0 %v1160_v1  ;;  %v753_v33 = vsel %vm4060_vm7, %v3098_v53, -inf  ;;  %v3107_v1 = vpop.f32.mrf.mxu1  ;;  %vm1103_vm9 = vcmask 7168   ;;  %v1154_v45 = vmul.f32 %v2799_v37, %v3098_v53  ;;  %vm4064_vm7 = vmmov %vm4054_vm5 }
 0x136   : > { %1176 = vadd.xlane.f32.xlu1 %v1156_v11  ;;  %v1158_v25 = vmul.f32 %v2939_v4, %v3107_v1 }
 0x137   : > { %1192 = vadd.xlane.f32.xlu2 %v1164_v14  ;;  %v757_v14 = vsel %vm4061_vm10, %v3107_v1, -inf  ;;  %vm4065_vm10 = vmmov %vm4054_vm5 }
 0x13b   : > { %v3109_v11 = vpop.f32.mrf.mxu2 }
 0x13c   : > { %v1162_v4 = vmul.f32 %v3021_v32, %v3109_v11  ;;  %v1236_v32 = vld [vmem:[#allocation5 + $0x20] sm:$0xff] }
 0x13d   : > { %1178 = vadd.xlane.f32.xlu0 %v1157_v30  ;;  %v1232_v30 = vld [vmem:[#allocation5] sm:$0xff]  ;;  %v3133_v37 = vpop.f32.mrf.mxu1 }
 0x13e   : > { %1170 = vadd.xlane.f32.xlu1 %v1153_v47  ;;  %v761_v47 = vsel %vm4062_vm15, %v3109_v11, -inf  ;;  %vm4066_vm15 = vmmov %vm4054_vm5 }
 0x13f   : > { %785 = vmax.xlane.f32.xlu2 %v752_v3  ;;  %v1234_v3 = vld [vmem:[#allocation5 + $0x10] sm:$0xff] }
 0x145   : > { %801 = vmax.xlane.f32.xlu0 %v760_v51 }
 0x146   : > { %809 = vmax.xlane.f32.xlu1 %v764_v52 }
 0x147   : > { %793 = vmax.xlane.f32.xlu2 %v756_v54 }
 0x14d   : > { %787 = vmax.xlane.f32.xlu0 %v753_v33 }
 0x14e   : > { %1194 = vadd.xlane.f32.xlu1 %v1165_v0  ;;  %v1233_v0 = vld [vmem:[#allocation5 + $0x8] sm:$0xff] }
 0x14f   : > { %1186 = vadd.xlane.f32.xlu2 %v1161_v34  ;;  %v3121_v34 = vpop.f32.mrf.mxu3 }
 0x154   : > { %v1249_v51 = vpop.xlane.xlu1 %1248 }
 0x155   : > { %795 = vmax.xlane.f32.xlu0 %v757_v14  ;;  %v1280_v52 = vadd.f32 %v1249_v51, %v1232_v30  ;;  %v1253_v54 = vpop.xlane.xlu2 %1252  ;;  %v1237_v14 = vld [vmem:[#allocation5 + $0x28] sm:$0xff]  ;;  %v765_v30 = vsel %vm4063_vm12, %v3121_v34, -inf }
 0x156   : > { %803 = vmax.xlane.f32.xlu1 %v761_v47  ;;  %v1282_v33 = vadd.f32 %v1253_v54, %v1234_v3 }
 0x157   : > { %1180 = vadd.xlane.f32.xlu2 %v1158_v25  ;;  %1296 = vst.msk [vmem:[#allocation5] sm:$0xff] %vm1103_vm9, %v1280_v52 }
 0x158   : > { %1298 = vst.msk [vmem:[#allocation5 + $0x10] sm:$0xff] %vm1103_vm9, %v1282_v33  ;;  %v3135_v33 = vpop.f32.mrf.mxu0 }
 0x15c   : > { %v1251_v47 = vpop.xlane.xlu0 %1250 }
 0x15d   : > { %1172 = vadd.xlane.f32.xlu0 %v1154_v45  ;;  %v1281_v3 = vadd.f32 %v1251_v47, %v1233_v0  ;;  %v1255_v51 = vpop.xlane.xlu1 %1254  ;;  %v1259_v25 = vpop.xlane.xlu2 %1258  ;;  %v1166_v45 = vmul.f32 %v2917_v62, %v3121_v34  ;;  %v1238_v0 = vld [vmem:[#allocation5 + $0x30] sm:$0xff] }
 0x15e   : > { %1188 = vadd.xlane.f32.xlu1 %v1162_v4  ;;  %v1283_v52 = vadd.f32 %v1255_v51, %v1235_v19  ;;  %v1285_v54 = vadd.f32 %v1259_v25, %v1237_v14  ;;  %v758_v19 = vsel %vm4054_vm5, %v3133_v37, -inf  ;;  %v1240_v14 = vld [vmem:[#allocation5 + $0x40] sm:$0xff]  ;;  %v754_v4 = vsel %vm4064_vm7, %v3135_v33, -inf }
 0x15f   : > { %811 = vmax.xlane.f32.xlu2 %v765_v30  ;;  %1297 = vst.msk [vmem:[#allocation5 + $0x8] sm:$0xff] %vm1103_vm9, %v1281_v3 }
 0x160   : > { %1299 = vst.msk [vmem:[#allocation5 + $0x18] sm:$0xff] %vm1103_vm9, %v1283_v52 }
 0x161   : > { %1301 = vst.msk [vmem:[#allocation5 + $0x28] sm:$0xff] %vm1103_vm9, %v1285_v54  ;;  %v3147_v54 = vpop.f32.mrf.mxu3 }
 0x162   : > { %v766_v36 = vsel %vm4065_vm10, %v3147_v54, -inf }
 0x164   : > { %v1257_v30 = vpop.xlane.xlu0 %1256 }
 0x165   : > { %1196 = vadd.xlane.f32.xlu0 %v1166_v45  ;;  %v1284_v47 = vadd.f32 %v1257_v30, %v1236_v32  ;;  %v1261_v3 = vpop.xlane.xlu1 %1260  ;;  %v1265_v51 = vpop.xlane.xlu2 %1264  ;;  %v1239_v45 = vld [vmem:[#allocation5 + $0x38] sm:$0xff]  ;;  %v1241_v32 = vld [vmem:[#allocation5 + $0x48] sm:$0xff] }
 0x166   : > { %797 = vmax.xlane.f32.xlu1 %v758_v19  ;;  %v1286_v25 = vadd.f32 %v1261_v3, %v1238_v0  ;;  %v1288_v52 = vadd.f32 %v1265_v51, %v1240_v14  ;;  %v1243_v30 = vld [vmem:[#allocation5 + $0x58] sm:$0xff]  ;;  %v1159_v19 = vmul.f32 %v2976_v18, %v3133_v37  ;;  %v1155_v14 = vmul.f32 %v2884_v55, %v3135_v33  ;;  %v1242_v18 = vld [vmem:[#allocation5 + $0x50] sm:$0xff]  ;;  %v1244_v55 = vld [vmem:[#allocation5 + $0x60] sm:$0xff] }
 0x167   : > { %789 = vmax.xlane.f32.xlu2 %v754_v4  ;;  %1300 = vst.msk [vmem:[#allocation5 + $0x20] sm:$0xff] %vm1103_vm9, %v1284_v47 }
 0x168   : > { %1302 = vst.msk [vmem:[#allocation5 + $0x30] sm:$0xff] %vm1103_vm9, %v1286_v25 }
 0x169   : > { %1304 = vst.msk [vmem:[#allocation5 + $0x40] sm:$0xff] %vm1103_vm9, %v1288_v52  ;;  %v3158_v52 = vpop.f32.mrf.mxu2 }
 0x16c   : > { %v1263_v0 = vpop.xlane.xlu0 %1262 }
 0x16d   : > { %813 = vmax.xlane.f32.xlu0 %v766_v36  ;;  %v1287_v4 = vadd.f32 %v1263_v0, %v1239_v45  ;;  %v1267_v47 = vpop.xlane.xlu1 %1266  ;;  %v1271_v3 = vpop.xlane.xlu2 %1270  ;;  %v1163_v36 = vmul.f32 %v2984_v5, %v3158_v52  ;;  %v762_v45 = vsel %vm4066_vm15, %v3158_v52, -inf  ;;  %v3171_v5 = vld [vmem:[#allocation2] sm:$0xff] }
 0x16e   : > { %1182 = vadd.xlane.f32.xlu1 %v1159_v19  ;;  %v1289_v51 = vadd.f32 %v1267_v47, %v1241_v32  ;;  %v1291_v25 = vadd.f32 %v1271_v3, %v1243_v30 }
 0x16f   : > { %1174 = vadd.xlane.f32.xlu2 %v1155_v14  ;;  %1303 = vst.msk [vmem:[#allocation5 + $0x38] sm:$0xff] %vm1103_vm9, %v1287_v4  ;;  %v1167_v14 = vmul.f32 %v3045_v48, %v3147_v54  ;;  %v1136_v4 = vld [vmem:[#allocation4] sm:$0xff] }
 0x170   : > { %1305 = vst.msk [vmem:[#allocation5 + $0x48] sm:$0xff] %vm1103_vm9, %v1289_v51 }
 0x171   : > { %1307 = vst.msk [vmem:[#allocation5 + $0x58] sm:$0xff] %vm1103_vm9, %v1291_v25 }
 0x174   : > { %v1269_v32 = vpop.xlane.xlu0 %1268 }
 0x175   : > { %1190 = vadd.xlane.f32.xlu0 %v1163_v36  ;;  %v1290_v30 = vadd.f32 %v1269_v32, %v1242_v18  ;;  %v1273_v19 = vpop.xlane.xlu1 %1272  ;;  %v3182_v18 = vld [vmem:[#allocation2 + $0x60] sm:$0xff] }
 0x176   : > { %v1292_v0 = vadd.f32 %v1273_v19, %v1244_v55  ;;  %v3184_v36 = vld [vmem:[#allocation2 + $0x20] sm:$0xff] }
 0x177   : > { %805 = vmax.xlane.f32.xlu2 %v762_v45  ;;  %1306 = vst.msk [vmem:[#allocation5 + $0x50] sm:$0xff] %vm1103_vm9, %v1290_v30  ;;  %v3186_v45 = vld [vmem:[#allocation2 + $0x40] sm:$0xff] }
 0x178   : > { %1308 = vst.msk [vmem:[#allocation5 + $0x60] sm:$0xff] %vm1103_vm9, %v1292_v0 }
 0x17f   : > { %1198 = vadd.xlane.f32.xlu2 %v1167_v14 }
 0x199   : > { %v784_v47 = vpop.xlane.xlu1 %783 }
 0x19a   : > { %v3174_v13 = vmax.f32 %v3171_v5, %v784_v47  ;;  %v1169_v3 = vpop.xlane.xlu2 %1168 }
 0x19b   : > { %v1200_v51 = vadd.f32 %v1169_v3, %v1136_v4  ;;  %v1141_v3 = vld [vmem:[#allocation4 + $0x28] sm:$0xff] }
 0x19c   : > { %1120 = vst.msk [vmem:[#allocation2] sm:$0xff] %vm1103_vm9, %v3174_v13  ;;  %881 = vperm.xlu1 %2147, %v3174_v13  }
 0x19d   : > { %1216 = vst.msk [vmem:[#allocation4] sm:$0xff] %vm1103_vm9, %v1200_v51  ;;  %v1144_v51 = vld [vmem:[#allocation4 + $0x40] sm:$0xff] }
 0x1a0   : > { %v808_v55 = vpop.xlane.xlu0 %807 }
 0x1a1   : > { %v3189_v32 = vmax.f32 %v3182_v18, %v808_v55  ;;  %v792_v30 = vpop.xlane.xlu1 %791  ;;  %v1140_v55 = vld [vmem:[#allocation4 + $0x20] sm:$0xff] }
 0x1a2   : > { %v3192_v19 = vmax.f32 %v3184_v36, %v792_v30  ;;  %v800_v0 = vpop.xlane.xlu2 %799 }
 0x1a3   : > { %1132 = vst.msk [vmem:[#allocation2 + $0x60] sm:$0xff] %vm1103_vm9, %v3189_v32  ;;  %v3199_v4 = vmax.f32 %v3186_v45, %v800_v0  ;;  %v1148_v0 = vld [vmem:[#allocation4 + $0x60] sm:$0xff] }
 0x1a4   : > { %1124 = vst.msk [vmem:[#allocation2 + $0x20] sm:$0xff] %vm1103_vm9, %v3192_v19  ;;  %941 = vperm.xlu1 %2147, %v3189_v32   ;;  %901 = vperm.xlu0 %2146, %v3192_v19  }
 0x1a5   : > { %1128 = vst.msk [vmem:[#allocation2 + $0x40] sm:$0xff] %vm1103_vm9, %v3199_v4  ;;  %921 = vperm.xlu2 %2148, %v3199_v4  }
 0x1a8   : > { %v1185_v30 = vpop.xlane.xlu0 %1184 }
 0x1a9   : > { %v1208_v14 = vadd.f32 %v1185_v30, %v1144_v51  ;;  %v1177_v47 = vpop.xlane.xlu1 %1176  ;;  %v3257_v30 = vld [vmem:[#allocation2 + $0x10] sm:$0xff] }
 0x1aa   : > { %v1204_v25 = vadd.f32 %v1177_v47, %v1140_v55  ;;  %v1193_v35 = vpop.xlane.xlu2 %1192  ;;  %4068 = vst [vmem:[#allocation30_spill] sm:$0xff] %v3257_v30 }
 0x1ab   : > { %1224 = vst.msk [vmem:[#allocation4 + $0x40] sm:$0xff] %vm1103_vm9, %v1208_v14  ;;  %v1212_v61 = vadd.f32 %v1193_v35, %v1148_v0  ;;  %v1149_v0 = vld [vmem:[#allocation4 + $0x68] sm:$0xff] }
 0x1ac   : > { %1220 = vst.msk [vmem:[#allocation4 + $0x20] sm:$0xff] %vm1103_vm9, %v1204_v25 }
 0x1ad   : > { %1228 = vst.msk [vmem:[#allocation4 + $0x60] sm:$0xff] %vm1103_vm9, %v1212_v61  ;;  %v3227_v61 = vld [vmem:[#allocation2 + $0x48] sm:$0xff] }
 0x1b0   : > { %v1179_v60 = vpop.xlane.xlu0 %1178 }
 0x1b1   : > { %v1205_v57 = vadd.f32 %v1179_v60, %v1141_v3  ;;  %v1171_v42 = vpop.xlane.xlu1 %1170  ;;  %v3229_v60 = vld [vmem:[#allocation2 + $0x68] sm:$0xff] }
 0x1b2   : > { %v1201_v16 = vadd.f32 %v1171_v42, %v1137_v9  ;;  %v786_v24 = vpop.xlane.xlu2 %785  ;;  %v3231_v9 = vld [vmem:[#allocation2 + $0x28] sm:$0xff] }
 0x1b3   : > { %1221 = vst.msk [vmem:[#allocation4 + $0x28] sm:$0xff] %vm1103_vm9, %v1205_v57  ;;  %v3219_v47 = vmax.f32 %v3215_v44, %v786_v24 }
 0x1b4   : > { %1217 = vst.msk [vmem:[#allocation4 + $0x8] sm:$0xff] %vm1103_vm9, %v1201_v16 }
 0x1b5   : > { %1121 = vst.msk [vmem:[#allocation2 + $0x8] sm:$0xff] %vm1103_vm9, %v3219_v47  ;;  %886 = vperm.xlu2 %2148, %v3219_v47  }
 0x1b8   : > { %v802_v42 = vpop.xlane.xlu0 %801 }
 0x1b9   : > { %v3234_v24 = vmax.f32 %v3227_v61, %v802_v42  ;;  %v810_v57 = vpop.xlane.xlu1 %809 }
 0x1ba   : > { %v3237_v16 = vmax.f32 %v3229_v60, %v810_v57  ;;  %v794_v25 = vpop.xlane.xlu2 %793  ;;  %v1145_v57 = vld [vmem:[#allocation4 + $0x48] sm:$0xff] }
 0x1bb   : > { %1129 = vst.msk [vmem:[#allocation2 + $0x48] sm:$0xff] %vm1103_vm9, %v3234_v24  ;;  %926 = vperm.xlu1 %2147, %v3234_v24   ;;  %v3245_v3 = vmax.f32 %v3231_v9, %v794_v25 }
 0x1bc   : > { %4067 = vst [vmem:[#allocation29_spill] sm:$0xff] %v3237_v16  ;;  %946 = vperm.xlu0 %2146, %v3237_v16  }
 0x1bd   : > { %1133 = vst.msk [vmem:[#allocation2 + $0x68] sm:$0xff] %vm1103_vm9, %v3237_v16  ;;  %906 = vperm.xlu2 %2148, %v3245_v3  }
 0x1be   : > { %1125 = vst.msk [vmem:[#allocation2 + $0x28] sm:$0xff] %vm1103_vm9, %v3245_v3 }
 0x1c0   : > { %v788_v42 = vpop.xlane.xlu0 %787 }
 0x1c1   : > { %v3260_v25 = vmax.f32 %v3257_v30, %v788_v42  ;;  %v1195_v51 = vpop.xlane.xlu1 %1194  ;;  %v3271_v42 = vld [vmem:[#allocation2 + $0x50] sm:$0xff] }
 0x1c2   : > { %v1213_v14 = vadd.f32 %v1195_v51, %v1149_v0  ;;  %v1187_v35 = vpop.xlane.xlu2 %1186  ;;  %4071 = vst [vmem:[#allocation33_spill] sm:$0xff] %v3271_v42  ;;  %v1142_v51 = vld [vmem:[#allocation4 + $0x30] sm:$0xff] }
 0x1c3   : > { %4069 = vst [vmem:[#allocation31_spill] sm:$0xff] %v3260_v25  ;;  %v1209_v55 = vadd.f32 %v1187_v35, %v1145_v57 }
 0x1c4   : > { %1122 = vst.msk [vmem:[#allocation2 + $0x10] sm:$0xff] %vm1103_vm9, %v3260_v25  ;;  %891 = vperm.xlu0 %2146, %v3260_v25  }
 0x1c5   : > { %1229 = vst.msk [vmem:[#allocation4 + $0x68] sm:$0xff] %vm1103_vm9, %v1213_v14  ;;  %v3290_v14 = vld [vmem:[#allocation2 + $0x70] sm:$0xff] }
 0x1c6   : > { %1225 = vst.msk [vmem:[#allocation4 + $0x48] sm:$0xff] %vm1103_vm9, %v1209_v55 }
 0x1c7   : > { %4074 = vst [vmem:[#allocation36_spill] sm:$0xff] %v3290_v14 }
 0x1c8   : > { %v796_v15 = vpop.xlane.xlu0 %795 }
 0x1c9   : > { %v3274_v0 = vmax.f32 %v3269_v12, %v796_v15  ;;  %v804_v20 = vpop.xlane.xlu1 %803  ;;  %v1138_v15 = vld [vmem:[#allocation4 + $0x10] sm:$0xff] }
 0x1ca   : > { %v3277_v22 = vmax.f32 %v3271_v42, %v804_v20  ;;  %v1181_v35 = vpop.xlane.xlu2 %1180  ;;  %v1146_v20 = vld [vmem:[#allocation4 + $0x50] sm:$0xff] }
 0x1cb   : > { %4072 = vst [vmem:[#allocation34_spill] sm:$0xff] %v3274_v0  ;;  %911 = vperm.xlu1 %2147, %v3274_v0   ;;  %v1206_v55 = vadd.f32 %v1181_v35, %v1142_v51 }
 0x1cc   : > { %4073 = vst [vmem:[#allocation35_spill] sm:$0xff] %v3277_v22  ;;  %931 = vperm.xlu0 %2146, %v3277_v22  }
 0x1cd   : > { %1126 = vst.msk [vmem:[#allocation2 + $0x30] sm:$0xff] %vm1103_vm9, %v3274_v0 }
 0x1ce   : > { %1130 = vst.msk [vmem:[#allocation2 + $0x50] sm:$0xff] %vm1103_vm9, %v3277_v22 }
 0x1cf   : > { %1222 = vst.msk [vmem:[#allocation4 + $0x30] sm:$0xff] %vm1103_vm9, %v1206_v55  ;;  %v1150_v55 = vld [vmem:[#allocation4 + $0x70] sm:$0xff] }
 0x1d0   : > { %v1173_v25 = vpop.xlane.xlu0 %1172 }
 0x1d1   : > { %v1202_v12 = vadd.f32 %v1173_v25, %v1138_v15  ;;  %v1189_v30 = vpop.xlane.xlu1 %1188  ;;  %v3302_v25 = vld [vmem:[#allocation2 + $0x38] sm:$0xff] }
 0x1d2   : > { %v1210_v16 = vadd.f32 %v1189_v30, %v1146_v20  ;;  %v812_v0 = vpop.xlane.xlu2 %811  ;;  %4076 = vst [vmem:[#allocation38_spill] sm:$0xff] %v3302_v25  ;;  %v3304_v15 = vld [vmem:[#allocation2 + $0x18] sm:$0xff] }
 0x1d3   : > { %1218 = vst.msk [vmem:[#allocation4 + $0x10] sm:$0xff] %vm1103_vm9, %v1202_v12  ;;  %v3294_v51 = vmax.f32 %v3290_v14, %v812_v0 }
 0x1d4   : > { %1226 = vst.msk [vmem:[#allocation4 + $0x50] sm:$0xff] %vm1103_vm9, %v1210_v16 }
 0x1d5   : > { %4075 = vst [vmem:[#allocation37_spill] sm:$0xff] %v3294_v51  ;;  %951 = vperm.xlu2 %2148, %v3294_v51  }
 0x1d6   : > { %1134 = vst.msk [vmem:[#allocation2 + $0x70] sm:$0xff] %vm1103_vm9, %v3294_v51 }
 0x1d7   : > { %4077 = vst [vmem:[#allocation39_spill] sm:$0xff] %v3304_v15 }
 0x1d8   : > { %v1197_v30 = vpop.xlane.xlu0 %1196 }
 0x1d9   : > { %v1214_v12 = vadd.f32 %v1197_v30, %v1150_v55  ;;  %v798_v20 = vpop.xlane.xlu1 %797  ;;  %v3323_v30 = vld [vmem:[#allocation2 + $0x78] sm:$0xff] }
 0x1da   : > { %v3307_v0 = vmax.f32 %v3302_v25, %v798_v20  ;;  %v790_v16 = vpop.xlane.xlu2 %789  ;;  %4080 = vst [vmem:[#allocation42_spill] sm:$0xff] %v3323_v30 }
 0x1db   : > { %1230 = vst.msk [vmem:[#allocation4 + $0x70] sm:$0xff] %vm1103_vm9, %v1214_v12  ;;  %v3311_v35 = vmax.f32 %v3304_v15, %v790_v16  ;;  %v1143_v12 = vld [vmem:[#allocation4 + $0x38] sm:$0xff] }
 0x1dc   : > { %4078 = vst [vmem:[#allocation40_spill] sm:$0xff] %v3307_v0  ;;  %916 = vperm.xlu0 %2146, %v3307_v0   ;;  %v1139_v16 = vld [vmem:[#allocation4 + $0x18] sm:$0xff] }
 0x1dd   : > { %4079 = vst [vmem:[#allocation41_spill] sm:$0xff] %v3311_v35  ;;  %896 = vperm.xlu1 %2147, %v3311_v35  }
 0x1de   : > { %1127 = vst.msk [vmem:[#allocation2 + $0x38] sm:$0xff] %vm1103_vm9, %v3307_v0 }
 0x1df   : > { %1123 = vst.msk [vmem:[#allocation2 + $0x18] sm:$0xff] %vm1103_vm9, %v3311_v35  ;;  %v1147_v35 = vld [vmem:[#allocation4 + $0x58] sm:$0xff] }
 0x1e0   : > { %v814_v20 = vpop.xlane.xlu0 %813 }
 0x1e1   : > { %v3326_v57 = vmax.f32 %v3323_v30, %v814_v20  ;;  %v1183_v25 = vpop.xlane.xlu1 %1182  ;;  %v3335_v20 = vld [vmem:[#allocation2 + $0x58] sm:$0xff] }
 0x1e2   : > { %v1207_v51 = vadd.f32 %v1183_v25, %v1143_v12  ;;  %v1175_v14 = vpop.xlane.xlu2 %1174  ;;  %4082 = vst [vmem:[#allocation44_spill] sm:$0xff] %v3335_v20 }
 0x1e3   : > { %4081 = vst [vmem:[#allocation43_spill] sm:$0xff] %v3326_v57  ;;  %v1203_v55 = vadd.f32 %v1175_v14, %v1139_v16 }
 0x1e4   : > { %1135 = vst.msk [vmem:[#allocation2 + $0x78] sm:$0xff] %vm1103_vm9, %v3326_v57 }
 0x1e5   : > { %1223 = vst.msk [vmem:[#allocation4 + $0x38] sm:$0xff] %vm1103_vm9, %v1207_v51  ;;  %956 = vperm.xlu1 %2147, %v3326_v57   ;;  %v1151_v51 = vld [vmem:[#allocation4 + $0x78] sm:$0xff] }
 0x1e6   : > { %1219 = vst.msk [vmem:[#allocation4 + $0x18] sm:$0xff] %vm1103_vm9, %v1203_v55 }
 0x1e8   : > { %v1191_v15 = vpop.xlane.xlu0 %1190 }
 0x1e9   : > { %v1211_v22 = vadd.f32 %v1191_v15, %v1147_v35 }
 0x1ea   : > { %v806_v25 = vpop.xlane.xlu2 %805 }
 0x1eb   : > { %1227 = vst.msk [vmem:[#allocation4 + $0x58] sm:$0xff] %vm1103_vm9, %v1211_v22  ;;  %v3339_v12 = vmax.f32 %v3335_v20, %v806_v25 }
 0x1ed   : > { %4083 = vst [vmem:[#allocation45_spill] sm:$0xff] %v3339_v12  ;;  %936 = vperm.xlu2 %2148, %v3339_v12  }
 0x1ee   : > { %1131 = vst.msk [vmem:[#allocation2 + $0x58] sm:$0xff] %vm1103_vm9, %v3339_v12 }
 0x1f2   : > { %v1199_v55 = vpop.xlane.xlu2 %1198 }
 0x1f3   : > { %v1215_v16 = vadd.f32 %v1199_v55, %v1151_v51 }
 0x1f5   : > { %1231 = vst.msk [vmem:[#allocation4 + $0x78] sm:$0xff] %vm1103_vm9, %v1215_v16 }
 0x1ff   : > { %v922_v35 = vpop.permute.xlu2 %921 }
 0x200   : > { %v967_v15 = vsub.f32 %v3056_v21, %v922_v35 }
 0x202   : > { %v991_v22 = vmul.f32 1.442695, %v967_v15 }
 0x204   : > { %2150 = vpow2.f32 %v991_v22 }
 0x20a   : > { %v2151_v25 = vpop.eup %2150 }
 0x20b   : > { %v1015_v14 = vsel %vm2890_vm14, %v2151_v25, 0.0  ;;  %vm4089_vm14 = vnez %v4015_v43 }
 0x20e   : > { %v882_v0 = vpop.permute.xlu1 %881 }
 0x20f   : > { %v959_v57 = vsub.f32 %v3047_v49, %v882_v0  ;;  %1071 = vadd.xlane.f32.xlu1 %v1015_v14  ;;  %v887_v30 = vpop.permute.xlu2 %886 }
 0x210   : > { %v960_v22 = vsub.f32 %v3076_v28, %v887_v30 }
 0x211   : > { %v975_v12 = vmul.f32 1.442695, %v959_v57 }
 0x212   : > { %v977_v57 = vmul.f32 1.442695, %v960_v22 }
 0x213   : > { %2152 = vpow2.f32 %v975_v12 }
 0x216   : > { %v902_v20 = vpop.permute.xlu0 %901  ;;  %v942_v51 = vpop.permute.xlu1 %941 }
 0x217   : > { %v963_v55 = vsub.f32 %v3054_v58, %v902_v20  ;;  %v971_v16 = vsub.f32 %v3058_v63, %v942_v51  ;;  %v907_v21 = vpop.permute.xlu2 %906 }
 0x218   : > { %v964_v35 = vsub.f32 %v3074_v17, %v907_v21 }
 0x219   : > { %v2153_v15 = vpop.eup %2152  ;;  %v983_v56 = vmul.f32 1.442695, %v963_v55  ;;  %v999_v25 = vmul.f32 1.442695, %v971_v16 }
 0x21a   : > { %v985_v42 = vmul.f32 1.442695, %v964_v35  ;;  %v1007_v49 = vsel %vm2752_vm6, %v2153_v15, 0.0  ;;  %vm4084_vm6 = vnez %v4004_v27 }
 0x21b   : > { %2154 = vpow2.f32 %v983_v56  ;;  %1055 = vadd.xlane.f32.xlu0 %v1007_v49 }
 0x21c   : > { %2156 = vpow2.f32 %v999_v25 }
 0x21d   : > { %2158 = vpow2.f32 %v985_v42 }
 0x21e   : > { %2160 = vpow2.f32 %v977_v57 }
 0x221   : > { %v2155_v58 = vpop.eup %2154 }
 0x222   : > { %v2157_v63 = vpop.eup %2156  ;;  %v1011_v17 = vsel %vm2821_vm4, %v2155_v58, 0.0  ;;  %vm4087_vm4 = vnez %v4034_v7 }
 0x223   : > { %v2159_v0 = vpop.eup %2158  ;;  %v1019_v28 = vsel %vm3014_vm8, %v2157_v63, 0.0  ;;  %1063 = vadd.xlane.f32.xlu2 %v1011_v17  ;;  %vm4088_vm8 = vnez %v4031_v6  ;;  %v4090_v6 = vsub.f32 %v3186_v45, %v3199_v4  ;;  %v4093_v45 = vsub.f32 %v3182_v18, %v3189_v32  ;;  %v1027_v32 = vld [vmem:[#allocation3 + $0x20] sm:$0xff] }
 0x224   : > { %1079 = vadd.xlane.f32.xlu0 %v1019_v28  ;;  %v1012_v23 = vsel %vm2806_vm1, %v2159_v0, 0.0  ;;  %v2161_v30 = vpop.eup %2160  ;;  %vm4086_vm1 = vnez %v4021_v50 }
 0x225   : > { %1065 = vadd.xlane.f32.xlu1 %v1012_v23  ;;  %v1008_v42 = vsel %vm2772_vm11, %v2161_v30, 0.0  ;;  %vm4085_vm11 = vnez %v4026_v59  ;;  %v871_v4 = vmul.f32 1.442695, %v4093_v45 }
 0x22b   : > { %1057 = vadd.xlane.f32.xlu2 %v1008_v42 }
 0x22d   : > { %v927_v20 = vpop.permute.xlu1 %926 }
 0x22e   : > { %v968_v12 = vsub.f32 %v3085_v2, %v927_v20  ;;  %v947_v41 = vpop.permute.xlu0 %946 }
 0x22f   : > { %v972_v14 = vsub.f32 %v3087_v40, %v947_v41  ;;  %v952_v55 = vpop.permute.xlu2 %951 }
 0x230   : > { %v993_v51 = vmul.f32 1.442695, %v968_v12  ;;  %v973_v29 = vsub.f32 %v3121_v34, %v952_v55 }
 0x231   : > { %v1001_v31 = vmul.f32 1.442695, %v972_v14 }
 0x232   : > { %2162 = vpow2.f32 %v993_v51  ;;  %v1003_v40 = vmul.f32 1.442695, %v973_v29 }
 0x233   : > { %2164 = vpow2.f32 %v1001_v31 }
 0x236   : > { %v892_v16 = vpop.permute.xlu0 %891 }
 0x237   : > { %v961_v38 = vsub.f32 %v3098_v53, %v892_v16  ;;  %v863_v16 = vmul.f32 1.442695, %v4090_v6  ;;  %v4105_v6 = vld [vmem:[#allocation33_spill] sm:$0xff] }
 0x238   : > { %v2163_v21 = vpop.eup %2162 }
 0x239   : > { %v2165_v35 = vpop.eup %2164  ;;  %v979_v15 = vmul.f32 1.442695, %v961_v38  ;;  %v1016_v22 = vsel %vm2963_vm3, %v2163_v21, 0.0  ;;  %v1031_v38 = vld [vmem:[#allocation3 + $0x40] sm:$0xff]  ;;  %v4091_v21 = vsub.f32 %v3171_v5, %v3174_v13 }
 0x23a   : > { %1073 = vadd.xlane.f32.xlu0 %v1016_v22  ;;  %v1020_v2 = vsel %vm3008_vm0, %v2165_v35, 0.0  ;;  %v4094_v22 = vsub.f32 %v3231_v9, %v3245_v3  ;;  %v1023_v13 = vld [vmem:[#allocation3] sm:$0xff]  ;;  %v1028_v9 = vld [vmem:[#allocation3 + $0x28] sm:$0xff] }
 0x23b   : > { %2166 = vpow2.f32 %v979_v15  ;;  %1081 = vadd.xlane.f32.xlu2 %v1020_v2 }
 0x23c   : > { %2168 = vpow2.f32 %v1003_v40  ;;  %v857_v5 = vmul.f32 1.442695, %v4094_v22 }
 0x23d   : > { %v912_v56 = vpop.permute.xlu1 %911 }
 0x23e   : > { %v965_v25 = vsub.f32 %v3107_v1, %v912_v56  ;;  %v932_v49 = vpop.permute.xlu0 %931 }
 0x23f   : > { %v969_v53 = vsub.f32 %v3109_v11, %v932_v49  ;;  %v1035_v49 = vld [vmem:[#allocation3 + $0x60] sm:$0xff] }
 0x240   : > { %v987_v57 = vmul.f32 1.442695, %v965_v25 }
 0x241   : > { %v2167_v58 = vpop.eup %2166  ;;  %v995_v34 = vmul.f32 1.442695, %v969_v53 }
 0x242   : > { %2170 = vpow2.f32 %v987_v57  ;;  %v1009_v10 = vsel %vm4084_vm6, %v2167_v58, 0.0  ;;  %v2169_v8 = vpop.eup %2168 }
 0x243   : > { %2172 = vpow2.f32 %v995_v34  ;;  %1059 = vadd.xlane.f32.xlu1 %v1009_v10  ;;  %v1021_v27 = vsel %vm4086_vm1, %v2169_v8, 0.0 }
 0x247   : > { %v937_v63 = vpop.permute.xlu2 %936 }
 0x248   : > { %v2171_v17 = vpop.eup %2170  ;;  %v970_v0 = vsub.f32 %v3158_v52, %v937_v63 }
 0x249   : > { %v2173_v28 = vpop.eup %2172  ;;  %v1013_v1 = vsel %vm4085_vm11, %v2171_v17, 0.0 }
 0x24a   : > { %v997_v11 = vmul.f32 1.442695, %v970_v0  ;;  %1067 = vadd.xlane.f32.xlu0 %v1013_v1  ;;  %v1017_v23 = vsel %vm2992_vm13, %v2173_v28, 0.0  ;;  %v1024_v0 = vld [vmem:[#allocation3 + $0x8] sm:$0xff] }
 0x24b   : > { %1075 = vadd.xlane.f32.xlu2 %v1017_v23  ;;  %1083 = vadd.xlane.f32.xlu1 %v1021_v27 }
 0x24c   : > { %2174 = vpow2.f32 %v997_v11  ;;  %v4096_v11 = vsub.f32 %v3227_v61, %v3234_v24 }
 0x24e   : > { %v917_v30 = vpop.permute.xlu0 %916  ;;  %v865_v23 = vmul.f32 1.442695, %v4096_v11 }
 0x24f   : > { %v966_v42 = vsub.f32 %v3133_v37, %v917_v30  ;;  %v897_v20 = vpop.permute.xlu1 %896  ;;  %v4097_v30 = vld [vmem:[#allocation29_spill] sm:$0xff] }
 0x250   : > { %v962_v52 = vsub.f32 %v3135_v33, %v897_v20 }
 0x251   : > { %v989_v12 = vmul.f32 1.442695, %v966_v42  ;;  %v4098_v42 = vsub.f32 %v3229_v60, %v4097_v30 }
 0x252   : > { %v2175_v59 = vpop.eup %2174  ;;  %v981_v41 = vmul.f32 1.442695, %v962_v52  ;;  %v4099_v52 = vld [vmem:[#allocation30_spill] sm:$0xff] }
 0x253   : > { %2176 = vpow2.f32 %v989_v12  ;;  %v1018_v26 = vsel %vm4087_vm4, %v2175_v59, 0.0  ;;  %v873_v20 = vmul.f32 1.442695, %v4098_v42  ;;  %v4100_v12 = vld [vmem:[#allocation31_spill] sm:$0xff] }
 0x254   : > { %2178 = vpow2.f32 %v981_v41  ;;  %1077 = vadd.xlane.f32.xlu1 %v1018_v26  ;;  %v4101_v59 = vsub.f32 %v4099_v52, %v4100_v12  ;;  %v4121_v52 = vld [vmem:[#allocation43_spill] sm:$0xff] }
 0x256   : > { %v851_v41 = vmul.f32 1.442695, %v4101_v59 }
 0x257   : > { %v957_v50 = vpop.permute.xlu1 %956 }
 0x258   : > { %v974_v14 = vsub.f32 %v3147_v54, %v957_v50  ;;  %v1032_v50 = vld [vmem:[#allocation3 + $0x48] sm:$0xff] }
 0x259   : > { %v2177_v51 = vpop.eup %2176 }
 0x25a   : > { %v2179_v31 = vpop.eup %2178  ;;  %v1005_v55 = vmul.f32 1.442695, %v974_v14  ;;  %v1014_v37 = vsel %vm4088_vm8, %v2177_v51, 0.0  ;;  %v1036_v51 = vld [vmem:[#allocation3 + $0x68] sm:$0xff] }
 0x25b   : > { %1069 = vadd.xlane.f32.xlu2 %v1014_v37  ;;  %v1010_v33 = vsel %vm4089_vm14, %v2179_v31, 0.0  ;;  %v4103_v37 = vld [vmem:[#allocation34_spill] sm:$0xff] }
 0x25c   : > { %2180 = vpow2.f32 %v1005_v55  ;;  %1061 = vadd.xlane.f32.xlu0 %v1010_v33  ;;  %1278 = vadd.xlane.f32.xlu1 %v3045_v48  ;;  %v847_v48 = vmul.f32 1.442695, %v4091_v21  ;;  %v4102_v55 = vld [vmem:[#allocation32_spill] sm:$0xff] }
 0x25d   : > { %2182 = vpow2.f32 %v863_v16  ;;  %v4104_v60 = vsub.f32 %v4102_v55, %v4103_v37  ;;  %v4106_v16 = vld [vmem:[#allocation35_spill] sm:$0xff] }
 0x25e   : > { %2184 = vpow2.f32 %v847_v48  ;;  %v4108_v48 = vld [vmem:[#allocation36_spill] sm:$0xff] }
 0x25f   : > { %v859_v33 = vmul.f32 1.442695, %v4104_v60 }
 0x262   : > { %v2181_v7 = vpop.eup %2180 }
 0x263   : > { %1276 = vadd.xlane.f32.xlu2 %v2917_v62  ;;  %v1022_v54 = vsel %vm3037_vm2, %v2181_v7, 0.0  ;;  %v2183_v43 = vpop.eup %2182 }
 0x264   : > { %1085 = vadd.xlane.f32.xlu0 %v1022_v54  ;;  %v1047_v35 = vmul.f32 %v2183_v43, %v1031_v38  ;;  %v2185_v15 = vpop.eup %2184  ;;  %v4107_v43 = vsub.f32 %v4105_v6, %v4106_v16  ;;  %v1038_v6 = vld [vmem:[#allocation3 + $0x78] sm:$0xff]  ;;  %v1246_v16 = vld [vmem:[#allocation5 + $0x70] sm:$0xff] }
 0x265   : > { %v1039_v2 = vmul.f32 %v2185_v15, %v1023_v13  ;;  %v4111_v13 = vld [vmem:[#allocation44_spill] sm:$0xff] }
 0x266   : > { %v867_v38 = vmul.f32 1.442695, %v4107_v43 }
 0x26c   : > { %1274 = vadd.xlane.f32.xlu0 %v3028_v39  ;;  %v4092_v39 = vsub.f32 %v3184_v36, %v3192_v19  ;;  %v4095_v36 = vsub.f32 %v3215_v44, %v3219_v47 }
 0x26e   : > { %v855_v46 = vmul.f32 1.442695, %v4092_v39  ;;  %v849_v19 = vmul.f32 1.442695, %v4095_v36  ;;  %v1029_v36 = vld [vmem:[#allocation3 + $0x30] sm:$0xff] }
 0x270   : > { %2186 = vpow2.f32 %v855_v46  ;;  %v1025_v46 = vld [vmem:[#allocation3 + $0x10] sm:$0xff] }
 0x271   : > { %2188 = vpow2.f32 %v871_v4 }
 0x272   : > { %2190 = vpow2.f32 %v857_v5 }
 0x273   : > { %2192 = vpow2.f32 %v849_v19 }
 0x274   : > { %2194 = vpow2.f32 %v865_v23  ;;  %v1034_v23 = vld [vmem:[#allocation3 + $0x58] sm:$0xff] }
 0x275   : > { %2196 = vpow2.f32 %v873_v20  ;;  %v4120_v20 = vld [vmem:[#allocation42_spill] sm:$0xff] }
 0x276   : > { %v2187_v18 = vpop.eup %2186  ;;  %2198 = vpow2.f32 %v851_v41  ;;  %v4122_v12 = vsub.f32 %v4120_v20, %v4121_v52 }
 0x277   : > { %v2189_v25 = vpop.eup %2188  ;;  %v1043_v3 = vmul.f32 %v2187_v18, %v1027_v32  ;;  %2200 = vpow2.f32 %v859_v33  ;;  %v1037_v18 = vld [vmem:[#allocation3 + $0x70] sm:$0xff] }
 0x278   : > { %v2191_v53 = vpop.eup %2190  ;;  %v1051_v57 = vmul.f32 %v2189_v25, %v1035_v49  ;;  %2202 = vpow2.f32 %v867_v38  ;;  %v1033_v32 = vld [vmem:[#allocation3 + $0x50] sm:$0xff]  ;;  %v877_v59 = vmul.f32 1.442695, %v4122_v12 }
 0x279   : > { %v1044_v8 = vmul.f32 %v2191_v53, %v1028_v9  ;;  %v2193_v47 = vpop.eup %2192 }
 0x27a   : > { %v1040_v28 = vmul.f32 %v2193_v47, %v1024_v0  ;;  %v2195_v26 = vpop.eup %2194  ;;  %v4117_v47 = vld [vmem:[#allocation39_spill] sm:$0xff]  ;;  %v4118_v0 = vld [vmem:[#allocation41_spill] sm:$0xff] }
 0x27b   : > { %v2197_v14 = vpop.eup %2196  ;;  %v1048_v61 = vmul.f32 %v2195_v26, %v1032_v50  ;;  %v1030_v26 = vld [vmem:[#allocation3 + $0x38] sm:$0xff] }
 0x27c   : > { %v1052_v31 = vmul.f32 %v2197_v14, %v1036_v51  ;;  %v2199_v39 = vpop.eup %2198  ;;  %v1026_v14 = vld [vmem:[#allocation3 + $0x18] sm:$0xff] }
 0x27d   : > { %v1041_v45 = vmul.f32 %v2199_v39, %v1025_v46  ;;  %v2201_v22 = vpop.eup %2200 }
 0x27e   : > { %v2203_v5 = vpop.eup %2202  ;;  %v1045_v25 = vmul.f32 %v2201_v22, %v1029_v36 }
 0x27f   : > { %v1049_v9 = vmul.f32 %v2203_v5, %v1033_v32 }
 0x282   : > { %v1072_v29 = vpop.xlane.xlu1 %1071 }
 0x283   : > { %v1095_v62 = vadd.f32 %v1072_v29, %v1047_v35  ;;  %v4109_v35 = vld [vmem:[#allocation37_spill] sm:$0xff] }
 0x284   : > { %v4110_v29 = vsub.f32 %v4108_v48, %v4109_v35 }
 0x285   : > { %1112 = vst.msk [vmem:[#allocation3 + $0x40] sm:$0xff] %vm1103_vm9, %v1095_v62 }
 0x286   : > { %v875_v62 = vmul.f32 1.442695, %v4110_v29  ;;  %v1245_v29 = vld [vmem:[#allocation5 + $0x68] sm:$0xff] }
 0x288   : > { %2204 = vpow2.f32 %v875_v62 }
 0x28e   : > { %v1056_v40 = vpop.xlane.xlu0 %1055  ;;  %v2205_v19 = vpop.eup %2204 }
 0x28f   : > { %v1087_v56 = vadd.f32 %v1056_v40, %v1039_v2  ;;  %v4112_v2 = vld [vmem:[#allocation45_spill] sm:$0xff]  ;;  %v1053_v53 = vmul.f32 %v2205_v19, %v1037_v18 }
 0x290   : > { %v4113_v40 = vsub.f32 %v4111_v13, %v4112_v2 }
 0x291   : > { %1104 = vst.msk [vmem:[#allocation3] sm:$0xff] %vm1103_vm9, %v1087_v56 }
 0x292   : > { %v869_v56 = vmul.f32 1.442695, %v4113_v40 }
 0x294   : > { %2206 = vpow2.f32 %v869_v56 }
 0x296   : > { %v1064_v58 = vpop.xlane.xlu2 %1063 }
 0x297   : > { %v1080_v34 = vpop.xlane.xlu0 %1079  ;;  %v1091_v10 = vadd.f32 %v1064_v58, %v1043_v3 }
 0x298   : > { %v1099_v63 = vadd.f32 %v1080_v34, %v1051_v57  ;;  %v1066_v17 = vpop.xlane.xlu1 %1065 }
 0x299   : > { %1108 = vst.msk [vmem:[#allocation3 + $0x20] sm:$0xff] %vm1103_vm9, %v1091_v10  ;;  %v1092_v44 = vadd.f32 %v1066_v17, %v1044_v8  ;;  %v4114_v8 = vld [vmem:[#allocation38_spill] sm:$0xff] }
 0x29a   : > { %1116 = vst.msk [vmem:[#allocation3 + $0x60] sm:$0xff] %vm1103_vm9, %v1099_v63  ;;  %v4115_v63 = vld [vmem:[#allocation40_spill] sm:$0xff]  ;;  %v2207_v11 = vpop.eup %2206 }
 0x29b   : > { %1109 = vst.msk [vmem:[#allocation3 + $0x28] sm:$0xff] %vm1103_vm9, %v1092_v44  ;;  %v4116_v17 = vsub.f32 %v4114_v8, %v4115_v63 }
 0x29d   : > { %v861_v44 = vmul.f32 1.442695, %v4116_v17 }
 0x29e   : > { %v1058_v1 = vpop.xlane.xlu2 %1057 }
 0x29f   : > { %v1088_v27 = vadd.f32 %v1058_v1, %v1040_v28  ;;  %v4119_v28 = vsub.f32 %v4117_v47, %v4118_v0  ;;  %2208 = vpow2.f32 %v861_v44 }
 0x2a1   : > { %1105 = vst.msk [vmem:[#allocation3 + $0x8] sm:$0xff] %vm1103_vm9, %v1088_v27  ;;  %v853_v1 = vmul.f32 1.442695, %v4119_v28  ;;  %v1050_v27 = vmul.f32 %v2207_v11, %v1034_v23 }
 0x2a3   : > { %2210 = vpow2.f32 %v853_v1 }
 0x2a4   : > { %2212 = vpow2.f32 %v877_v59 }
 0x2a5   : > { %v2209_v41 = vpop.eup %2208 }
 0x2a6   : > { %v1046_v51 = vmul.f32 %v2209_v41, %v1030_v26 }
 0x2a9   : > { %v2211_v50 = vpop.eup %2210 }
 0x2ad   : > { %v1074_v24 = vpop.xlane.xlu0 %1073 }
 0x2ae   : > { %v1096_v7 = vadd.f32 %v1074_v24, %v1048_v61  ;;  %v1082_v54 = vpop.xlane.xlu2 %1081  ;;  %v1247_v61 = vld [vmem:[#allocation5 + $0x78] sm:$0xff] }
 0x2af   : > { %v1100_v21 = vadd.f32 %v1082_v54, %v1052_v31  ;;  %v1042_v31 = vmul.f32 %v2211_v50, %v1026_v14  ;;  %v2213_v54 = vpop.eup %2212 }
 0x2b0   : > { %1113 = vst.msk [vmem:[#allocation3 + $0x48] sm:$0xff] %vm1103_vm9, %v1096_v7  ;;  %v1054_v38 = vmul.f32 %v2213_v54, %v1038_v6 }
 0x2b1   : > { %1117 = vst.msk [vmem:[#allocation3 + $0x68] sm:$0xff] %vm1103_vm9, %v1100_v21 }
 0x2b6   : > { %v1060_v4 = vpop.xlane.xlu1 %1059 }
 0x2b7   : > { %v1089_v15 = vadd.f32 %v1060_v4, %v1041_v45 }
 0x2b9   : > { %1106 = vst.msk [vmem:[#allocation3 + $0x10] sm:$0xff] %vm1103_vm9, %v1089_v15 }
 0x2bd   : > { %v1068_v49 = vpop.xlane.xlu0 %1067 }
 0x2be   : > { %v1093_v3 = vadd.f32 %v1068_v49, %v1045_v25  ;;  %v1084_v57 = vpop.xlane.xlu1 %1083  ;;  %v1076_v58 = vpop.xlane.xlu2 %1075 }
 0x2bf   : > { %v1101_v34 = vadd.f32 %v1084_v57, %v1053_v53  ;;  %v1097_v10 = vadd.f32 %v1076_v58, %v1049_v9 }
 0x2c0   : > { %1110 = vst.msk [vmem:[#allocation3 + $0x30] sm:$0xff] %vm1103_vm9, %v1093_v3 }
 0x2c1   : > { %1118 = vst.msk [vmem:[#allocation3 + $0x70] sm:$0xff] %vm1103_vm9, %v1101_v34 }
 0x2c2   : > { %1114 = vst.msk [vmem:[#allocation3 + $0x50] sm:$0xff] %vm1103_vm9, %v1097_v10 }
 0x2c7   : > { %v1078_v30 = vpop.xlane.xlu1 %1077 }
 0x2c8   : > { %v1098_v42 = vadd.f32 %v1078_v30, %v1050_v27 }
 0x2ca   : > { %1115 = vst.msk [vmem:[#allocation3 + $0x58] sm:$0xff] %vm1103_vm9, %v1098_v42 }
 0x2ce   : > { %v1070_v24 = vpop.xlane.xlu2 %1069 }
 0x2cf   : > { %v1094_v55 = vadd.f32 %v1070_v24, %v1046_v51  ;;  %v1062_v37 = vpop.xlane.xlu0 %1061  ;;  %v1279_v60 = vpop.xlane.xlu1 %1278 }
 0x2d0   : > { %v1090_v33 = vadd.f32 %v1062_v37, %v1042_v31  ;;  %v1295_v7 = vadd.f32 %v1279_v60, %v1247_v61 }
 0x2d1   : > { %1111 = vst.msk [vmem:[#allocation3 + $0x38] sm:$0xff] %vm1103_vm9, %v1094_v55 }
 0x2d2   : > { %1107 = vst.msk [vmem:[#allocation3 + $0x18] sm:$0xff] %vm1103_vm9, %v1090_v33 }
 0x2d3   : > { %1311 = vst.msk [vmem:[#allocation5 + $0x78] sm:$0xff] %vm1103_vm9, %v1295_v7 }
 0x2d6   : > { %v1277_v43 = vpop.xlane.xlu2 %1276 }
 0x2d7   : > { %v1294_v21 = vadd.f32 %v1277_v43, %v1246_v16  ;;  %v1086_v48 = vpop.xlane.xlu0 %1085 }
 0x2d8   : > { %v1102_v35 = vadd.f32 %v1086_v48, %v1054_v38 }
 0x2d9   : > { %1310 = vst.msk [vmem:[#allocation5 + $0x70] sm:$0xff] %vm1103_vm9, %v1294_v21 }
 0x2da   : > { %1119 = vst.msk [vmem:[#allocation3 + $0x78] sm:$0xff] %vm1103_vm9, %v1102_v35 }
 0x2de   : > { %1315 = sbr.rel (%p2013_p2) target bundleno = 952 (0x3b8), region = 44 }
 0x2df   : > { %v1275_v62 = vpop.xlane.xlu0 %1274 }
 0x2e0   : > { %v1293_v39 = vadd.f32 %v1275_v62, %v1245_v29 }
 0x2e2   : > { %1309 = vst.msk [vmem:[#allocation5 + $0x68] sm:$0xff] %vm1103_vm9, %v1293_v39 }
 0x2e3   : > { %v1352_v46 = vld [vmem:[#allocation3 + $0x20] sm:$0xff]  ;;  %v2381_v45 = vmov 0   ;;  %v1350_v15 = vld [vmem:[#allocation3 + $0x10] sm:$0xff]  ;;  %v1353_v56 = vld [vmem:[#allocation3 + $0x28] sm:$0xff] }
 0x2e4   : > { %2216 = vset.pattern.permute.xlu2 %v2381_v45  ;;  %2215 = vset.pattern.permute.xlu1 %v2381_v45  ;;  %2217 = vlog2.f32 %v1352_v46  ;;  %v3466_v4 = vld [vmem:[#allocation5 + $0x20] sm:$0xff]  ;;  %v3469_v22 = vld [vmem:[#allocation5 + $0x10] sm:$0xff]  ;;  %v3477_v19 = vld [vmem:[#allocation5 + $0x28] sm:$0xff] }
 0x2e5   : > { %2214 = vset.pattern.permute.xlu0 %v2381_v45  ;;  %2219 = vrcp.f32 %v3466_v4  ;;  %v1348_v5 = vld [vmem:[#allocation3] sm:$0xff]  ;;  %v1513_v2 = vand.u32 2147483647, %v3466_v4  ;;  %v1515_v40 = vand.u32 2147483648, %v3466_v4  ;;  %v1483_v36 = vand.u32 2147483647, %v3469_v22 }
 0x2e6   : > { %2221 = vlog2.f32 %v1350_v15  ;;  %v3471_v13 = vld [vmem:[#allocation5] sm:$0xff]  ;;  %vm1509_vm3 = vweird.f32 %v3466_v4  ;;  %v1485_v18 = vand.u32 2147483648, %v3469_v22  ;;  %vm1479_vm13 = vweird.f32 %v3469_v22  ;;  %v3486_v9 = vld [vmem:[#allocation5 + $0x18] sm:$0xff]  ;;  %v1334_v50 = vld [vmem:[#allocation2 + $0x10] sm:$0xff] }
 0x2e7   : > { %2223 = vrcp.f32 %v3469_v22  ;;  %v1455_v32 = vand.u32 2147483648, %v3471_v13  ;;  %v1453_v49 = vand.u32 2147483647, %v3471_v13  ;;  %v1530_v53 = vand.u32 2147483648, %v3477_v19  ;;  %v1336_v8 = vld [vmem:[#allocation2 + $0x20] sm:$0xff]  ;;  %v1351_v47 = vld [vmem:[#allocation3 + $0x18] sm:$0xff] }
 0x2e8   : > { %2225 = vlog2.f32 %v1348_v5  ;;  %vm3490_vm0 = vcmp.eq.f32.partialorder %v1513_v2, 8.507059e+37  ;;  %v1516_v34 = vor.u32 1.1754944e-38, %v1515_v40  ;;  %vm3497_vm2 = vcmp.eq.f32.partialorder %v1483_v36, 8.507059e+37  ;;  %v1332_v51 = vld [vmem:[#allocation2] sm:$0xff]  ;;  %v1337_v16 = vld [vmem:[#allocation2 + $0x28] sm:$0xff]  ;;  %v1414_v2 = vld [vmem:[#allocation4 + $0x10] sm:$0xff] }
 0x2e9   : > { %2227 = vrcp.f32 %v3471_v13  ;;  %vm1449_vm9 = vweird.f32 %v3471_v13  ;;  %v1528_v44 = vand.u32 2147483647, %v3477_v19  ;;  %v1486_v28 = vor.u32 1.1754944e-38, %v1485_v18  ;;  %v4131_v55 = vld [vmem:[#allocation17_spill] sm:$0xff]  ;;  %v3549_v15 = vld [vmem:[#allocation5 + $0x8] sm:$0xff]  ;;  %v4146_v24 = vld [vmem:[#allocation16_spill] sm:$0xff] }
 0x2ea   : > { %v2218_v25 = vpop.eup %2217  ;;  %2229 = vlog2.f32 %v1353_v56  ;;  %v3503_v1 = vor.u32 1.1754944e-38, %v1455_v32  ;;  %vm1524_vm12 = vweird.f32 %v3477_v19  ;;  %vm3509_vm7 = vcmp.eq.f32.partialorder %v1453_v49, 8.507059e+37  ;;  %v1416_v21 = vld [vmem:[#allocation4 + $0x20] sm:$0xff]  ;;  %v3624_v40 = vld [vmem:[#allocation5 + $0x30] sm:$0xff] }
 0x2eb   : > { %v3488_v3 = vpop.eup %2219  ;;  %v1373_v57 = vmul.f32 0.6931472, %v2218_v25  ;;  %2231 = vrcp.f32 %v3477_v19  ;;  %v3513_v42 = vor.u32 1.1754944e-38, %v1530_v53  ;;  %vm3519_vm15 = vcmp.eq.f32.partialorder %v1528_v44, 8.507059e+37  ;;  %v1417_v44 = vld [vmem:[#allocation4 + $0x28] sm:$0xff]  ;;  %v4150_v58 = vld [vmem:[#allocation15_spill] sm:$0xff] }
 0x2ec   : > { %v2222_v10 = vpop.eup %2221  ;;  %v1505_v63 = vmul.f32 %v3488_v3, %v3466_v4  ;;  %2233 = vrcp.f32 %v3486_v9  ;;  %vm1510_vm5 = vweird.f32 %v3488_v3  ;;  %vm1320_vm6 = vcmp.lt.s32.totalorder %v4131_v55, 200 }
 0x2ed   : > { %v2224_v0 = vpop.eup %2223  ;;  %v3515_v52 = vadd.f32 %v1373_v57, %v1336_v8  ;;  %v1369_v12 = vmul.f32 0.6931472, %v2222_v10  ;;  %2235 = vlog2.f32 %v1351_v47  ;;  %vm3528_vm11 = vmor %vm1509_vm3, %vm1510_vm5  ;;  %vm1494_vm4 = vweird.f32 %v3486_v9 }
 0x2ee   : > { %v2226_v11 = vpop.eup %2225  ;;  %v1506_v23 = vsub.f32 1.0, %v1505_v63  ;;  %v1475_v27 = vmul.f32 %v2224_v0, %v3469_v22  ;;  %vm1480_vm10 = vweird.f32 %v2224_v0  ;;  %v1500_v33 = vand.u32 2147483648, %v3486_v9 }
 0x2ef   : > { %v2228_v20 = vpop.eup %2227  ;;  %v1365_v59 = vmul.f32 0.6931472, %v2226_v11  ;;  %v1398_v48 = vadd.f32 %v1369_v12, %v1334_v50  ;;  %vm3541_vm8 = vmor %vm1479_vm13, %vm1480_vm10  ;;  %v1498_v62 = vand.u32 2147483647, %v3486_v9  ;;  %2237 = vrcp.f32 %v3549_v15 }
 0x2f0   : > { %v2230_v41 = vpop.eup %2229  ;;  %v1507_v26 = vmul.f32 %v3488_v3, %v1506_v23  ;;  %v1476_v14 = vsub.f32 1.0, %v1475_v27  ;;  %v1445_v61 = vmul.f32 %v2228_v20, %v3471_v13  ;;  %vm1450_vm1 = vweird.f32 %v2228_v20  ;;  %v1412_v13 = vld [vmem:[#allocation4] sm:$0xff] }
 0x2f1   : > { %v2232_v31 = vpop.eup %2231  ;;  %v1375_v60 = vmul.f32 0.6931472, %v2230_v41  ;;  %v1396_v29 = vadd.f32 %v1365_v59, %v1332_v51  ;;  %vm3556_vm3 = vmor %vm1449_vm9, %vm1450_vm1  ;;  %v1501_v18 = vor.u32 1.1754944e-38, %v1500_v33  ;;  %v1356_v51 = vld [vmem:[#allocation3 + $0x40] sm:$0xff]  ;;  %vm1464_vm10 = vweird.f32 %v3549_v15  ;;  %v1359_v59 = vld [vmem:[#allocation3 + $0x58] sm:$0xff] }
 0x2f2   : > { %v1508_v7 = vadd.f32 %v3488_v3, %v1507_v26  ;;  %v1477_v54 = vmul.f32 %v2224_v0, %v1476_v14  ;;  %v1446_v6 = vsub.f32 1.0, %v1445_v61  ;;  %v1520_v43 = vmul.f32 %v2232_v31, %v3477_v19  ;;  %v3536_v38 = vpop.eup %2233  ;;  %v1415_v14 = vld [vmem:[#allocation4 + $0x18] sm:$0xff] }
 0x2f3   : > { %vm1525_vm14 = vweird.f32 %v2232_v31  ;;  %v2236_v5 = vpop.eup %2235  ;;  %v1401_v56 = vadd.f32 %v1375_v60, %v1337_v16  ;;  %v1490_v36 = vmul.f32 %v3536_v38, %v3486_v9  ;;  %v3608_v60 = vld [vmem:[#allocation5 + $0x40] sm:$0xff] }
 0x2f4   : > { %v1512_v39 = vsel %vm3528_vm11, %v3488_v3, %v1508_v7  ;;  %v1478_v46 = vadd.f32 %v2224_v0, %v1477_v54  ;;  %v1447_v45 = vmul.f32 %v2228_v20, %v1446_v6  ;;  %v1521_v4 = vsub.f32 1.0, %v1520_v43  ;;  %v1349_v3 = vld [vmem:[#allocation3 + $0x8] sm:$0xff]  ;;  %vm3569_vm13 = vmor %vm1524_vm12, %vm1525_vm14 }
 0x2f5   : > { %v1517_v22 = vsel %vm3490_vm0, %v1516_v34, %v1512_v39  ;;  %v1491_v34 = vsub.f32 1.0, %v1490_v36  ;;  %vm1495_vm0 = vweird.f32 %v3536_v38  ;;  %v1371_v47 = vmul.f32 0.6931472, %v2236_v5  ;;  %v2238_v61 = vpop.eup %2237  ;;  %v3619_v39 = vld [vmem:[#allocation5 + $0x38] sm:$0xff]  ;;  %v1338_v36 = vld [vmem:[#allocation2 + $0x30] sm:$0xff] }
 0x2f6   : > { %v1518_v32 = vmul.f32 %v1517_v22, %v1416_v21  ;;  %v1482_v25 = vsel %vm3541_vm8, %v2224_v0, %v1478_v46  ;;  %v1448_v49 = vadd.f32 %v2228_v20, %v1447_v45  ;;  %v1522_v53 = vmul.f32 %v2232_v31, %v1521_v4  ;;  %v4147_v45 = vld [vmem:[#allocation18_spill] sm:$0xff]  ;;  %v1355_v4 = vld [vmem:[#allocation3 + $0x38] sm:$0xff] }
 0x2f7   : > { %v1487_v57 = vsel %vm3497_vm2, %v1486_v28, %v1482_v25  ;;  %v1492_v0 = vmul.f32 %v3536_v38, %v1491_v34  ;;  %2239 = vlog2.f32 %v1349_v3  ;;  %vm3588_vm2 = vmor %vm1494_vm4, %vm1495_vm0  ;;  %vm3597_vm12 = vcmp.eq.f32.partialorder %v1498_v62, 8.507059e+37 }
 0x2f8   : > { %v1688_v10 = vsub.f32 %v1518_v32, %v3515_v52  ;;  %v1488_v8 = vmul.f32 %v1487_v57, %v1414_v2  ;;  %v1452_v63 = vsel %vm3556_vm3, %v2228_v20, %v1448_v49  ;;  %v1523_v17 = vadd.f32 %v2232_v31, %v1522_v53  ;;  %v1335_v52 = vld [vmem:[#allocation2 + $0x18] sm:$0xff]  ;;  %v1354_v53 = vld [vmem:[#allocation3 + $0x30] sm:$0xff]  ;;  %v1413_v57 = vld [vmem:[#allocation4 + $0x8] sm:$0xff] }
 0x2f9   : > { %v1457_v19 = vsel %vm3509_vm7, %v3503_v1, %v1452_v63  ;;  %v4142_v1 = vld [vmem:[#allocation14_spill] sm:$0xff]  ;;  %v1493_v12 = vadd.f32 %v3536_v38, %v1492_v0  ;;  %vm1321_vm7 = vcmp.lt.s32.totalorder %v4146_v24, 200  ;;  %v1460_v43 = vmul.f32 %v2238_v61, %v3549_v15  ;;  %v3642_v0 = vld [vmem:[#allocation5 + $0x58] sm:$0xff] }
 0x2fa   : > { %v1704_v28 = vmul.f32 -1.0, %v1688_v10  ;;  %v1686_v11 = vsub.f32 %v1488_v8, %v1398_v48  ;;  %v1458_v23 = vmul.f32 %v1457_v19, %v1412_v13  ;;  %v1527_v27 = vsel %vm3569_vm13, %v2232_v31, %v1523_v17  ;;  %v4145_v31 = vld [vmem:[#allocation13_spill] sm:$0xff] }
 0x2fb   : > { %vm1318_vm9 = vcmp.lt.s32.totalorder %v4142_v1, 200  ;;  %v1532_v30 = vsel %vm3519_vm15, %v3513_v42, %v1527_v27  ;;  %vm1316_vm5 = vcmp.lt.s32.totalorder %v4145_v31, 200  ;;  %v1399_v42 = vadd.f32 %v1371_v47, %v1335_v52 }
 0x2fc   : > { %v1720_v41 = vsel %vm1320_vm6, %v1704_v28, 0.0  ;;  %v1702_v9 = vmul.f32 -1.0, %v1686_v11  ;;  %v1684_v26 = vsub.f32 %v1458_v23, %v1396_v29  ;;  %v1533_v50 = vmul.f32 %v1532_v30, %v1417_v44  ;;  %v1340_v44 = vld [vmem:[#allocation2 + $0x40] sm:$0xff] }
 0x2fd   : > { %1754 = vperm.xlu2 %2216, %v1720_v41   ;;  %v1497_v37 = vsel %vm3588_vm2, %v3536_v38, %v1493_v12  ;;  %v2240_v6 = vpop.eup %2239  ;;  %2241 = vlog2.f32 %v1356_v51  ;;  %v1470_v48 = vand.u32 2147483648, %v3549_v15  ;;  %v1461_v29 = vsub.f32 1.0, %v1460_v43  ;;  %v3668_v43 = vld [vmem:[#allocation5 + $0x50] sm:$0xff] }
 0x2fe   : > { %v1718_v55 = vsel %vm1318_vm9, %v1702_v9, 0.0  ;;  %v1700_v33 = vmul.f32 -1.0, %v1684_v26  ;;  %v1689_v7 = vsub.f32 %v1533_v50, %v1401_v56  ;;  %v1502_v54 = vsel %vm3597_vm12, %v1501_v18, %v1497_v37  ;;  %v1333_v56 = vld [vmem:[#allocation2 + $0x8] sm:$0xff]  ;;  %v4153_v9 = vld [vmem:[#allocation21_spill] sm:$0xff]  ;;  %v1343_v50 = vld [vmem:[#allocation2 + $0x58] sm:$0xff] }
 0x2ff   : > { %1744 = vperm.xlu1 %2215, %v1718_v55   ;;  %v1503_v16 = vmul.f32 %v1502_v54, %v1415_v14  ;;  %2243 = vrcp.f32 %v3608_v60  ;;  %vm1465_vm15 = vweird.f32 %v2238_v61  ;;  %v1468_v62 = vand.u32 2147483647, %v3549_v15  ;;  %v1420_v37 = vld [vmem:[#allocation4 + $0x40] sm:$0xff]  ;;  %v1339_v54 = vld [vmem:[#allocation2 + $0x38] sm:$0xff] }
 0x300   : > { %v1716_v21 = vsel %vm1316_vm5, %v1700_v33, 0.0  ;;  %v1705_v38 = vmul.f32 -1.0, %v1689_v7  ;;  %vm1319_vm6 = vcmp.lt.s32.totalorder %v4147_v45, 200  ;;  %v1367_v22 = vmul.f32 0.6931472, %v2240_v6  ;;  %vm3628_vm11 = vmor %vm1464_vm10, %vm1465_vm15 }
 0x301   : > { %1734 = vperm.xlu0 %2214, %v1716_v21   ;;  %v1687_v35 = vsub.f32 %v1503_v16, %v1399_v42  ;;  %v1462_v2 = vmul.f32 %v2238_v61, %v1461_v29  ;;  %v1471_v18 = vor.u32 1.1754944e-38, %v1470_v48  ;;  %2245 = vrcp.f32 %v3619_v39 }
 0x302   : > { %v1721_v46 = vsel %vm1321_vm7, %v1705_v38, 0.0  ;;  %vm1469_vm1 = vcmp.eq.f32.partialorder %v1468_v62, 8.507059e+37  ;;  %2247 = vlog2.f32 %v1355_v4  ;;  %v1573_v13 = vand.u32 2147483647, %v3608_v60  ;;  %v4156_v38 = vld [vmem:[#allocation24_spill] sm:$0xff] }
 0x303   : > { %v1703_v5 = vmul.f32 -1.0, %v1687_v35  ;;  %v2242_v32 = vpop.eup %2241  ;;  %v1463_v49 = vadd.f32 %v2238_v61, %v1462_v2  ;;  %v1575_v15 = vand.u32 2147483648, %v3608_v60  ;;  %2249 = vrcp.f32 %v3624_v40 }
 0x304   : > { %vm1317_vm4 = vcmp.lt.s32.totalorder %v4150_v58, 200  ;;  %v1397_v34 = vadd.f32 %v1367_v22, %v1333_v56  ;;  %v1381_v17 = vmul.f32 0.6931472, %v2242_v32  ;;  %vm1569_vm8 = vweird.f32 %v3608_v60  ;;  %v1419_v56 = vld [vmem:[#allocation4 + $0x38] sm:$0xff] }
 0x305   : > { %1759 = vperm.xlu2 %2216, %v1721_v46   ;;  %v1719_v25 = vsel %vm1319_vm6, %v1703_v5, 0.0  ;;  %v2244_v3 = vpop.eup %2243  ;;  %v1467_v10 = vsel %vm3628_vm11, %v2238_v61, %v1463_v49  ;;  %2251 = vlog2.f32 %v1354_v53  ;;  %vm1554_vm3 = vweird.f32 %v3619_v39  ;;  %v1358_v46 = vld [vmem:[#allocation3 + $0x50] sm:$0xff] }
 0x306   : > { %v1565_v8 = vmul.f32 %v2244_v3, %v3608_v60  ;;  %v1472_v63 = vsel %vm1469_vm1, %v1471_v18, %v1467_v10  ;;  %vm1570_vm14 = vweird.f32 %v2244_v3  ;;  %vm3644_vm13 = vcmp.eq.f32.partialorder %v1573_v13, 8.507059e+37 }
 0x307   : > { %1749 = vperm.xlu1 %2215, %v1719_v25   ;;  %v1473_v19 = vmul.f32 %v1472_v63, %v1413_v57  ;;  %v2246_v28 = vpop.eup %2245  ;;  %v1576_v23 = vor.u32 1.1754944e-38, %v1575_v15  ;;  %v1558_v27 = vand.u32 2147483647, %v3619_v39  ;;  %v1560_v52 = vand.u32 2147483648, %v3619_v39  ;;  %vm3656_vm9 = vmor %vm1569_vm8, %vm1570_vm14  ;;  %v1418_v15 = vld [vmem:[#allocation4 + $0x30] sm:$0xff] }
 0x308   : > { %v1566_v47 = vsub.f32 1.0, %v1565_v8  ;;  %v2248_v20 = vpop.eup %2247  ;;  %v1550_v12 = vmul.f32 %v2246_v28, %v3619_v39  ;;  %vm1539_vm0 = vweird.f32 %v3624_v40  ;;  %vm1324_vm2 = vcmp.lt.s32.totalorder %v4153_v9, 200 }
 0x309   : > { %v1685_v1 = vsub.f32 %v1473_v19, %v1397_v34  ;;  %v2250_v41 = vpop.eup %2249  ;;  %v1404_v26 = vadd.f32 %v1381_v17, %v1340_v44  ;;  %vm1555_vm12 = vweird.f32 %v2246_v28  ;;  %v1543_v14 = vand.u32 2147483647, %v3624_v40  ;;  %v3709_v17 = vld [vmem:[#allocation5 + $0x48] sm:$0xff] }
 0x30a   : > { %v1567_v30 = vmul.f32 %v2244_v3, %v1566_v47  ;;  %2253 = vrcp.f32 %v3642_v0  ;;  %v1551_v31 = vsub.f32 1.0, %v1550_v12  ;;  %v1535_v24 = vmul.f32 %v2250_v41, %v3624_v40  ;;  %vm3676_vm10 = vmor %vm1554_vm3, %vm1555_vm12 }
 0x30b   : > { %v1701_v51 = vmul.f32 -1.0, %v1685_v1  ;;  %v2252_v42 = vpop.eup %2251  ;;  %v1379_v55 = vmul.f32 0.6931472, %v2248_v20  ;;  %vm1540_vm5 = vweird.f32 %v2250_v41  ;;  %v1545_v60 = vand.u32 2147483648, %v3624_v40  ;;  %v4165_v40 = vld [vmem:[#allocation22_spill] sm:$0xff] }
 0x30c   : > { %v1568_v61 = vadd.f32 %v2244_v3, %v1567_v30  ;;  %2255 = vlog2.f32 %v1359_v59  ;;  %v1552_v6 = vmul.f32 %v2246_v28, %v1551_v31  ;;  %v1536_v16 = vsub.f32 1.0, %v1535_v24  ;;  %vm3693_vm11 = vmor %vm1539_vm0, %vm1540_vm5 }
 0x30d   : > { %v1717_v33 = vsel %vm1317_vm4, %v1701_v51, 0.0  ;;  %vm1323_vm7 = vcmp.lt.s32.totalorder %v4156_v38, 200  ;;  %vm3680_vm15 = vcmp.eq.f32.partialorder %v1558_v27, 8.507059e+37  ;;  %v1561_v29 = vor.u32 1.1754944e-38, %v1560_v52  ;;  %v1342_v38 = vld [vmem:[#allocation2 + $0x50] sm:$0xff] }
 0x30e   : > { %v1572_v7 = vsel %vm3656_vm9, %v2244_v3, %v1568_v61  ;;  %1739 = vperm.xlu0 %2214, %v1717_v33   ;;  %vm3684_vm6 = vcmp.eq.f32.partialorder %v1543_v14, 8.507059e+37  ;;  %v1553_v4 = vadd.f32 %v2246_v28, %v1552_v6  ;;  %v1377_v5 = vmul.f32 0.6931472, %v2252_v42  ;;  %v1423_v42 = vld [vmem:[#allocation4 + $0x58] sm:$0xff]  ;;  %v1362_v6 = vld [vmem:[#allocation3 + $0x70] sm:$0xff] }
 0x30f   : > { %v1577_v21 = vsel %vm3644_vm13, %v1576_v23, %v1572_v7  ;;  %v1537_v22 = vmul.f32 %v2250_v41, %v1536_v16  ;;  %v1403_v39 = vadd.f32 %v1379_v55, %v1339_v54  ;;  %v1546_v32 = vor.u32 1.1754944e-38, %v1545_v60  ;;  %v3738_v55 = vld [vmem:[#allocation5 + $0x70] sm:$0xff]  ;;  %v4170_v60 = vld [vmem:[#allocation25_spill] sm:$0xff] }
 0x310   : > { %v1578_v45 = vmul.f32 %v1577_v21, %v1420_v37  ;;  %v3688_v2 = vpop.eup %2253  ;;  %v1620_v25 = vand.u32 2147483648, %v3642_v0  ;;  %2257 = vrcp.f32 %v3668_v43  ;;  %v1557_v53 = vsel %vm3676_vm10, %v2246_v28, %v1553_v4  ;;  %v1357_v28 = vld [vmem:[#allocation3 + $0x48] sm:$0xff] }
 0x311   : > { %v1538_v3 = vadd.f32 %v2250_v41, %v1537_v22  ;;  %2259 = vlog2.f32 %v1358_v46  ;;  %v1562_v13 = vsel %vm3680_vm15, %v1561_v29, %v1557_v53  ;;  %vm1322_vm1 = vcmp.lt.s32.totalorder %v4165_v40, 200  ;;  %v3761_v4 = vld [vmem:[#allocation5 + $0x68] sm:$0xff] }
 0x312   : > { %v1692_v49 = vsub.f32 %v1578_v45, %v1404_v26  ;;  %v2256_v57 = vpop.eup %2255  ;;  %v1610_v58 = vmul.f32 %v3688_v2, %v3642_v0  ;;  %vm1614_vm4 = vweird.f32 %v3642_v0  ;;  %v1563_v10 = vmul.f32 %v1562_v13, %v1419_v56 }
 0x313   : > { %v1402_v8 = vadd.f32 %v1377_v5, %v1338_v36  ;;  %v1542_v63 = vsel %vm3693_vm11, %v2250_v41, %v1538_v3  ;;  %vm1615_vm8 = vweird.f32 %v3688_v2  ;;  %v1618_v47 = vand.u32 2147483647, %v3642_v0  ;;  %v1422_v36 = vld [vmem:[#allocation4 + $0x50] sm:$0xff] }
 0x314   : > { %v1708_v34 = vmul.f32 -1.0, %v1692_v49  ;;  %v1547_v19 = vsel %vm3684_vm6, %v1546_v32, %v1542_v63  ;;  %v1611_v44 = vsub.f32 1.0, %v1610_v58  ;;  %v1691_v23 = vsub.f32 %v1563_v10, %v1403_v39  ;;  %vm3724_vm14 = vmor %vm1614_vm4, %vm1615_vm8  ;;  %v1341_v58 = vld [vmem:[#allocation2 + $0x48] sm:$0xff] }
 0x315   : > { %v1548_v27 = vmul.f32 %v1547_v19, %v1418_v15  ;;  %v1621_v52 = vor.u32 1.1754944e-38, %v1620_v25  ;;  %v1387_v1 = vmul.f32 0.6931472, %v2256_v57  ;;  %v1603_v12 = vand.u32 2147483647, %v3668_v43  ;;  %v1361_v25 = vld [vmem:[#allocation3 + $0x68] sm:$0xff] }
 0x316   : > { %v1724_v11 = vsel %vm1324_vm2, %v1708_v34, 0.0  ;;  %v2258_v20 = vpop.eup %2257  ;;  %v1612_v30 = vmul.f32 %v3688_v2, %v1611_v44  ;;  %2261 = vrcp.f32 %v3709_v17  ;;  %v1707_v41 = vmul.f32 -1.0, %v1691_v23  ;;  %v4175_v57 = vld [vmem:[#allocation27_spill] sm:$0xff]  ;;  %v4178_v44 = vld [vmem:[#allocation26_spill] sm:$0xff] }
 0x317   : > { %1774 = vperm.xlu2 %2216, %v1724_v11   ;;  %v2260_v59 = vpop.eup %2259  ;;  %v1690_v26 = vsub.f32 %v1548_v27, %v1402_v8  ;;  %v1595_v14 = vmul.f32 %v2258_v20, %v3668_v43  ;;  %2263 = vlog2.f32 %v1357_v28  ;;  %vm3730_vm3 = vcmp.eq.f32.partialorder %v1618_v47, 8.507059e+37  ;;  %v3777_v8 = vld [vmem:[#allocation5 + $0x60] sm:$0xff] }
 0x318   : > { %v1613_v51 = vadd.f32 %v3688_v2, %v1612_v30  ;;  %vm1599_vm13 = vweird.f32 %v3668_v43  ;;  %v1605_v31 = vand.u32 2147483648, %v3668_v43  ;;  %v1723_v0 = vsel %vm1323_vm7, %v1707_v41, 0.0 }
 0x319   : > { %v1706_v24 = vmul.f32 -1.0, %v1690_v26  ;;  %v1596_v37 = vsub.f32 1.0, %v1595_v14  ;;  %vm1600_vm0 = vweird.f32 %v2258_v20  ;;  %1769 = vperm.xlu1 %2215, %v1723_v0   ;;  %vm1327_vm2 = vcmp.lt.s32.totalorder %v4170_v60, 200  ;;  %v3804_v0 = vld [vmem:[#allocation5 + $0x78] sm:$0xff]  ;;  %v1346_v60 = vld [vmem:[#allocation2 + $0x70] sm:$0xff] }
 0x31a   : > { %v1407_v33 = vadd.f32 %v1387_v1, %v1343_v50  ;;  %v1617_v7 = vsel %vm3724_vm14, %v3688_v2, %v1613_v51  ;;  %v1385_v54 = vmul.f32 0.6931472, %v2260_v59  ;;  %vm3748_vm9 = vcmp.eq.f32.partialorder %v1603_v12, 8.507059e+37  ;;  %vm3755_vm12 = vmor %vm1599_vm13, %vm1600_vm0  ;;  %v1421_v12 = vld [vmem:[#allocation4 + $0x48] sm:$0xff] }
 0x31b   : > { %v1722_v16 = vsel %vm1322_vm1, %v1706_v24, 0.0  ;;  %v1622_v21 = vsel %vm3730_vm3, %v1621_v52, %v1617_v7  ;;  %v1597_v48 = vmul.f32 %v2258_v20, %v1596_v37  ;;  %v1606_v45 = vor.u32 1.1754944e-38, %v1605_v31 }
 0x31c   : > { %v2262_v29 = vpop.eup %2261  ;;  %1764 = vperm.xlu0 %2214, %v1722_v16   ;;  %v1623_v62 = vmul.f32 %v1622_v21, %v1423_v42  ;;  %vm1584_vm5 = vweird.f32 %v3709_v17  ;;  %2265 = vrcp.f32 %v3738_v55  ;;  %v1588_v39 = vand.u32 2147483647, %v3709_v17  ;;  %v1363_v21 = vld [vmem:[#allocation3 + $0x78] sm:$0xff] }
 0x31d   : > { %v2264_v5 = vpop.eup %2263  ;;  %v1598_v22 = vadd.f32 %v2258_v20, %v1597_v48  ;;  %v1580_v2 = vmul.f32 %v2262_v29, %v3709_v17  ;;  %2267 = vlog2.f32 %v1362_v6  ;;  %v1406_v43 = vadd.f32 %v1385_v54, %v1342_v38  ;;  %v4195_v54 = vld [vmem:[#allocation28_spill] sm:$0xff] }
 0x31e   : > { %v1695_v56 = vsub.f32 %v1623_v62, %v1407_v33  ;;  %v1590_v18 = vand.u32 2147483648, %v3709_v17  ;;  %v1663_v32 = vand.u32 2147483647, %v3738_v55  ;;  %vm1585_vm7 = vweird.f32 %v2262_v29  ;;  %v1360_v17 = vld [vmem:[#allocation3 + $0x60] sm:$0xff]  ;;  %v1426_v62 = vld [vmem:[#allocation4 + $0x70] sm:$0xff] }
 0x31f   : > { %v1602_v49 = vsel %vm3755_vm12, %v2258_v20, %v1598_v22  ;;  %v1581_v53 = vsub.f32 1.0, %v1580_v2  ;;  %2269 = vrcp.f32 %v3761_v4  ;;  %vm1326_vm10 = vcmp.lt.s32.totalorder %v4175_v57, 200  ;;  %vm3785_vm11 = vmor %vm1584_vm5, %vm1585_vm7  ;;  %v1345_v2 = vld [vmem:[#allocation2 + $0x68] sm:$0xff]  ;;  %v4189_v57 = vld [vmem:[#allocation19_spill] sm:$0xff] }
 0x320   : > { %v1711_v3 = vmul.f32 -1.0, %v1695_v56  ;;  %v1607_v13 = vsel %vm3748_vm9, %v1606_v45, %v1602_v49  ;;  %v1383_v40 = vmul.f32 0.6931472, %v2264_v5  ;;  %vm3773_vm15 = vcmp.eq.f32.partialorder %v1588_v39, 8.507059e+37 }
 0x321   : > { %v1608_v15 = vmul.f32 %v1607_v13, %v1422_v36  ;;  %v1582_v34 = vmul.f32 %v2262_v29, %v1581_v53  ;;  %2271 = vlog2.f32 %v1361_v25  ;;  %vm1325_vm6 = vcmp.lt.s32.totalorder %v4178_v44, 200  ;;  %v1425_v53 = vld [vmem:[#allocation4 + $0x68] sm:$0xff]  ;;  %v1344_v44 = vld [vmem:[#allocation2 + $0x60] sm:$0xff] }
 0x322   : > { %v2266_v63 = vpop.eup %2265  ;;  %v1727_v19 = vsel %vm1327_vm2, %v1711_v3, 0.0  ;;  %v1591_v28 = vor.u32 1.1754944e-38, %v1590_v18  ;;  %vm1659_vm1 = vweird.f32 %v3738_v55  ;;  %vm3790_vm4 = vcmp.eq.f32.partialorder %v1663_v32, 8.507059e+37 }
 0x323   : > { %v2268_v23 = vpop.eup %2267  ;;  %1789 = vperm.xlu2 %2216, %v1727_v19   ;;  %v1694_v27 = vsub.f32 %v1608_v15, %v1406_v43  ;;  %v1583_v52 = vadd.f32 %v2262_v29, %v1582_v34  ;;  %v1655_v20 = vmul.f32 %v2266_v63, %v3738_v55  ;;  %v1665_v1 = vand.u32 2147483648, %v3738_v55 }
 0x324   : > { %v1405_v30 = vadd.f32 %v1383_v40, %v1341_v58  ;;  %v1648_v59 = vand.u32 2147483647, %v3761_v4  ;;  %v1650_v41 = vand.u32 2147483648, %v3761_v4  ;;  %2273 = vrcp.f32 %v3777_v8 }
 0x325   : > { %v2270_v26 = vpop.eup %2269  ;;  %v1710_v50 = vmul.f32 -1.0, %v1694_v27  ;;  %v1587_v9 = vsel %vm3785_vm11, %v2262_v29, %v1583_v52  ;;  %v1656_v14 = vsub.f32 1.0, %v1655_v20  ;;  %vm1660_vm8 = vweird.f32 %v2266_v63 }
 0x326   : > { %v1592_v51 = vsel %vm3773_vm15, %v1591_v28, %v1587_v9  ;;  %v1393_v61 = vmul.f32 0.6931472, %v2268_v23  ;;  %v1640_v31 = vmul.f32 %v2270_v26, %v3761_v4  ;;  %2275 = vlog2.f32 %v1360_v17  ;;  %vm3810_vm14 = vmor %vm1659_vm1, %vm1660_vm8 }
 0x327   : > { %v2272_v24 = vpop.eup %2271  ;;  %v1726_v42 = vsel %vm1326_vm10, %v1710_v50, 0.0  ;;  %v1593_v37 = vmul.f32 %v1592_v51, %v1421_v12  ;;  %v1657_v33 = vmul.f32 %v2266_v63, %v1656_v14  ;;  %v1666_v7 = vor.u32 1.1754944e-38, %v1665_v1 }
 0x328   : > { %1784 = vperm.xlu1 %2215, %v1726_v42   ;;  %v1641_v6 = vsub.f32 1.0, %v1640_v31  ;;  %vm1644_vm3 = vweird.f32 %v3761_v4  ;;  %vm1645_vm13 = vweird.f32 %v2270_v26  ;;  %vm3815_vm0 = vcmp.eq.f32.partialorder %v1648_v59, 8.507059e+37 }
 0x329   : > { %v1693_v38 = vsub.f32 %v1593_v37, %v1405_v30  ;;  %v1658_v48 = vadd.f32 %v2266_v63, %v1657_v33  ;;  %v1651_v35 = vor.u32 1.1754944e-38, %v1650_v41  ;;  %2277 = vrcp.f32 %v3804_v0  ;;  %vm3826_vm9 = vmor %vm1644_vm3, %vm1645_vm13  ;;  %v4194_v41 = vld [vmem:[#allocation20_spill] sm:$0xff] }
 0x32a   : > { %v2274_v29 = vpop.eup %2273  ;;  %v1410_v55 = vadd.f32 %v1393_v61, %v1346_v60  ;;  %v1391_v46 = vmul.f32 0.6931472, %v2272_v24  ;;  %v1642_v45 = vmul.f32 %v2270_v26, %v1641_v6  ;;  %vm1629_vm2 = vweird.f32 %v3777_v8  ;;  %v1347_v24 = vld [vmem:[#allocation2 + $0x78] sm:$0xff] }
 0x32b   : > { %v1709_v5 = vmul.f32 -1.0, %v1693_v38  ;;  %v1662_v22 = vsel %vm3810_vm14, %v2266_v63, %v1658_v48  ;;  %v1625_v56 = vmul.f32 %v2274_v29, %v3777_v8  ;;  %2279 = vlog2.f32 %v1363_v21 }
 0x32c   : > { %v2276_v43 = vpop.eup %2275  ;;  %v1667_v36 = vsel %vm3790_vm4, %v1666_v7, %v1662_v22  ;;  %v1643_v18 = vadd.f32 %v2270_v26, %v1642_v45  ;;  %v1633_v32 = vand.u32 2147483647, %v3777_v8  ;;  %v1635_v25 = vand.u32 2147483648, %v3777_v8  ;;  %v1424_v8 = vld [vmem:[#allocation4 + $0x60] sm:$0xff]  ;;  %v1427_v7 = vld [vmem:[#allocation4 + $0x78] sm:$0xff] }
 0x32d   : > { %v1725_v49 = vsel %vm1325_vm6, %v1709_v5, 0.0  ;;  %v1668_v4 = vmul.f32 %v1667_v36, %v1426_v62  ;;  %v1626_v3 = vsub.f32 1.0, %v1625_v56  ;;  %vm1630_vm12 = vweird.f32 %v2274_v29 }
 0x32e   : > { %1779 = vperm.xlu0 %2214, %v1725_v49   ;;  %vm1330_vm5 = vcmp.lt.s32.totalorder %v4189_v57, 200  ;;  %v1409_v13 = vadd.f32 %v1391_v46, %v1345_v2  ;;  %v1647_v40 = vsel %vm3826_vm9, %v2270_v26, %v1643_v18  ;;  %v1389_v10 = vmul.f32 0.6931472, %v2276_v43  ;;  %vm3844_vm7 = vmor %vm1629_vm2, %vm1630_vm12 }
 0x32f   : > { %v2278_v15 = vpop.eup %2277  ;;  %v1698_v58 = vsub.f32 %v1668_v4, %v1410_v55  ;;  %v1652_v34 = vsel %vm3815_vm0, %v1651_v35, %v1647_v40  ;;  %v1627_v63 = vmul.f32 %v2274_v29, %v1626_v3  ;;  %vm3848_vm10 = vcmp.eq.f32.partialorder %v1633_v32, 8.507059e+37 }
 0x330   : > { %v1653_v19 = vmul.f32 %v1652_v34, %v1425_v53  ;;  %v1636_v11 = vor.u32 1.1754944e-38, %v1635_v25  ;;  %v1670_v23 = vmul.f32 %v2278_v15, %v3804_v0  ;;  %vm1674_vm15 = vweird.f32 %v3804_v0 }
 0x331   : > { %v2280_v27 = vpop.eup %2279  ;;  %v1714_v52 = vmul.f32 -1.0, %v1698_v58  ;;  %v1628_v20 = vadd.f32 %v2274_v29, %v1627_v63  ;;  %v1680_v1 = vand.u32 2147483648, %v3804_v0  ;;  %vm1675_vm6 = vweird.f32 %v2278_v15 }
 0x332   : > { %v1697_v17 = vsub.f32 %v1653_v19, %v1409_v13  ;;  %v1671_v30 = vsub.f32 1.0, %v1670_v23  ;;  %v1678_v12 = vand.u32 2147483647, %v3804_v0  ;;  %vm1329_vm11 = vcmp.lt.s32.totalorder %v4194_v41, 200  ;;  %vm1676_vm1 = vmor %vm1674_vm15, %vm1675_vm6 }
 0x333   : > { %v1730_v59 = vsel %vm1330_vm5, %v1714_v52, 0.0  ;;  %v1408_v26 = vadd.f32 %v1389_v10, %v1344_v44  ;;  %v1632_v50 = vsel %vm3844_vm7, %v2274_v29, %v1628_v20  ;;  %v1395_v51 = vmul.f32 0.6931472, %v2280_v27  ;;  %v4196_v29 = vld [vmem:[#allocation23_spill] sm:$0xff] }
 0x334   : > { %1804 = vperm.xlu2 %2216, %v1730_v59   ;;  %v1713_v9 = vmul.f32 -1.0, %v1697_v17  ;;  %v1637_v14 = vsel %vm3848_vm10, %v1636_v11, %v1632_v50  ;;  %v1672_v61 = vmul.f32 %v2278_v15, %v1671_v30  ;;  %v1681_v42 = vor.u32 1.1754944e-38, %v1680_v1 }
 0x335   : > { %v1638_v31 = vmul.f32 %v1637_v14, %v1424_v8  ;;  %vm1679_vm4 = vcmp.eq.f32.partialorder %v1678_v12, 8.507059e+37  ;;  %vm1328_vm8 = vcmp.lt.s32.totalorder %v4195_v54, 200  ;;  %v1411_v6 = vadd.f32 %v1395_v51, %v1347_v24 }
 0x336   : > { %v1729_v37 = vsel %vm1329_vm11, %v1713_v9, 0.0  ;;  %v1673_v60 = vadd.f32 %v2278_v15, %v1672_v61  ;;  %vm1331_vm14 = vcmp.lt.s32.totalorder %v4196_v29, 200 }
 0x337   : > { %1799 = vperm.xlu1 %2215, %v1729_v37   ;;  %v1696_v33 = vsub.f32 %v1638_v31, %v1408_v26 }
 0x338   : > { %v1677_v16 = vsel %vm1676_vm1, %v2278_v15, %v1673_v60 }
 0x339   : > { %v1712_v21 = vmul.f32 -1.0, %v1696_v33  ;;  %v1682_v38 = vsel %vm1679_vm4, %v1681_v42, %v1677_v16 }
 0x33a   : > { %v1683_v48 = vmul.f32 %v1682_v38, %v1427_v7 }
 0x33b   : > { %v1728_v0 = vsel %vm1328_vm8, %v1712_v21, 0.0 }
 0x33c   : > { %1794 = vperm.xlu0 %2214, %v1728_v0   ;;  %v1699_v35 = vsub.f32 %v1683_v48, %v1411_v6 }
 0x33e   : > { %v1715_v55 = vmul.f32 -1.0, %v1699_v35 }
 0x340   : > { %v1731_v62 = vsel %vm1331_vm14, %v1715_v55, 0.0 }
 0x344   : > { %1809 = vperm.xlu0 %2214, %v1731_v62  }
 0x357   : > { %v1755_v46 = vpop.permute.xlu2 %1754 }
 0x358   : > { %1816 = vst [vmem:[%s2506_s12 + $0x20] sm:$0xff] %v1755_v46 }
 0x35f   : > { %v1760_v45 = vpop.permute.xlu2 %1759 }
 0x360   : > { %1817 = vst [vmem:[%s2506_s12 + $0x28] sm:$0xff] %v1760_v45 }
 0x371   : > { %v1745_v5 = vpop.permute.xlu1 %1744  ;;  %v1775_v22 = vpop.permute.xlu2 %1774 }
 0x372   : > { %1814 = vst [vmem:[%s2506_s12 + $0x10] sm:$0xff] %v1745_v5 }
 0x373   : > { %1820 = vst [vmem:[%s2506_s12 + $0x40] sm:$0xff] %v1775_v22  ;;  %v1735_v2 = vpop.permute.xlu0 %1734 }
 0x374   : > { %1812 = vst [vmem:[%s2506_s12] sm:$0xff] %v1735_v2 }
 0x379   : > { %v1750_v39 = vpop.permute.xlu1 %1749 }
 0x37a   : > { %1815 = vst [vmem:[%s2506_s12 + $0x18] sm:$0xff] %v1750_v39 }
 0x37d   : > { %v1790_v56 = vpop.permute.xlu2 %1789 }
 0x37e   : > { %1823 = vst [vmem:[%s2506_s12 + $0x58] sm:$0xff] %v1790_v56 }
 0x380   : > { %v1740_v43 = vpop.permute.xlu0 %1739 }
 0x381   : > { %1813 = vst [vmem:[%s2506_s12 + $0x8] sm:$0xff] %v1740_v43 }
 0x38b   : > { %v1770_v36 = vpop.permute.xlu1 %1769 }
 0x38c   : > { %1819 = vst [vmem:[%s2506_s12 + $0x38] sm:$0xff] %v1770_v36 }
 0x38e   : > { %v1805_v18 = vpop.permute.xlu2 %1804  ;;  %v1765_v32 = vpop.permute.xlu0 %1764 }
 0x38f   : > { %1826 = vst [vmem:[%s2506_s12 + $0x70] sm:$0xff] %v1805_v18 }
 0x390   : > { %1818 = vst [vmem:[%s2506_s12 + $0x30] sm:$0xff] %v1765_v32 }
 0x39a   : > { %v1785_v25 = vpop.permute.xlu1 %1784 }
 0x39b   : > { %1822 = vst [vmem:[%s2506_s12 + $0x50] sm:$0xff] %v1785_v25 }
 0x3a0   : > { %v1780_v49 = vpop.permute.xlu0 %1779 }
 0x3a1   : > { %1821 = vst [vmem:[%s2506_s12 + $0x48] sm:$0xff] %v1780_v49 }
 0x3a9   : > { %v1800_v4 = vpop.permute.xlu1 %1799 }
 0x3aa   : > { %1825 = vst [vmem:[%s2506_s12 + $0x68] sm:$0xff] %v1800_v4 }
 0x3ae   : > { %v1795_v53 = vpop.permute.xlu0 %1794 }
 0x3af   : > { %1824 = vst [vmem:[%s2506_s12 + $0x60] sm:$0xff] %v1795_v53 }
 0x3b6   : > { %v1810_v3 = vpop.permute.xlu0 %1809 }
 0x3b7   : > { %1827 = vst [vmem:[%s2506_s12 + $0x78] sm:$0xff] %v1810_v3 }
 0x3b8 PF: > { %s1840_s8 = scalar_lea.hbm %s3933_s4, %s1963_s20  ;;  %s1841_s9 = sshll.u32 %s2506_s12, 4  ;;  %s1842_s9 = int_to_ptr.vmem [resolvable:$true] %s1841_s9 }
 0x3b9   : > { %s1843_s10 = sshll.u32 %s1840_s8, 4  ;;  %s4197_s11 = sand.u32 1, %s2351_s16   ;;  %s1844_s10 = int_to_ptr.hbm [resolvable:$true] %s1843_s10 }
 0x3ba   : > { %s1829_s13 = scalar_lea.sflag [#allocation7], %s4197_s11  ;;  %s2295_s14 = sshra.s32 %s1844_s10, 4  ;;  %s2296_s14 = int_to_ptr.hbm [resolvable:$true] %s2295_s14 }
 0x3bb   : > { %s2297_s23 = scalar_lea.hbm %s2296_s14, 128  ;;  %s2301_s29 = scalar_lea.hbm %s3933_s4, 256 }
 0x3bc   : > { %p2298_p4 = scmp.ne.s32.totalorder %s2296_s14, %s2297_s23  ;;  %p2302_p7 = scmp.lt.s32.totalorder %s2296_s14, %s3933_s4 }
 0x3bd   : > { %p2303_p8 = scmp.lt.s32.totalorder %s2301_s29, %s2297_s23 }
 0x3be   : > { %p2299_p5 = pnand %p2298_p4, %p2458_p3 }
 0x3bf   : > { %p2304_p10 = por %p2303_p8, %p2302_p7 }
 0x3c0   : > { %p2300_p6 = pneg %p2299_p5 }
 0x3c2   : > { %p2305_p11 = pnand %p2304_p10, %p2300_p6 }
 0x3c4   : > { %2308 = shalt.err (!%p2305_p11)
}
 0x3c5   : > { %s2382_s12 = smov 128   ;;  %s2383_s20 = smov 8  }
 0x3c6   : > { %2068 = dma.vmem_to_hbm [thread:$0]  (%p2458_p3), %s1842_s9, 2048, %s1844_s10, %s1829_s13, %s2382_s12, %s2382_s12, %s2383_s20  }
 0x3c7 PF: > { %p2074_p12 = scmp.ge.s32.totalorder %s2375_s22, 2  ;;  %s1858_s21 = sand.u32 1, %s2347_s15  }
 0x3c8   : > { %s1859_s25 = scalar_lea.sflag [#allocation7], %s1858_s21 }
 0x3c9   : > { %p2071_p13 = pnand %p2074_p12, %p2468_p9 }
 0x3cb   : > { %p2072_p0 = pneg %p2071_p13 }
 0x3cd   : > { %2342 = dma.done.wait (%p2072_p0), %s1859_s25, 2048  }
 0x3ce   : > { %2344 = vsyncadd (%p2072_p0), %s1859_s25, 4294965248  ;;  %s17_s22 = sadd.s32 1, %s2375_s22   ;;  %s4198_s18 = sld [smem:[#allocation9_spill]] }
 0x3cf   : > { %p14_p1 = scmp.ge.s32.totalorder %s17_s22, 6   ;;  %s4199_s19 = sld [smem:[#allocation10_spill]] }
 0x3d0   : > { %s4200_s20 = sld [smem:[#allocation11_spill]]  ;;  %s4202_s15 = smov %s2351_s16 }
 0x3d1   : > { %s4201_s21 = sld [smem:[#allocation12_spill]]  ;;  %s4203_s16 = smov %s2355_s17 }
 0x3d2   : > { %s4204_s17 = smov %s2476_s5  ;;  %16 = sbr.rel (!%p14_p1) target bundleno = 5 (0x5), region = 88 }
 0x3d7   :  { %1865 = vsyncpa [#allocation7], 1 }
 0x3d8   :  { %1867 = vsyncpa [#allocation7 + $0x1], 1 }

</bundles_post_ra>
